<compile_context>
chip_gen: v7x
topology: tpu7x:2x2x1
jax: 0.10.0
libtpu: 0.0.40
codegen_flags: <defaults>
</compile_context>

<pallas_src>
import math

import jax
import jax.numpy as jnp
import numpy as np
from jax import lax
from jax.experimental import pallas as pl
from jax.experimental.pallas import tpu as pltpu

# ----------------------------- small config ---------------------------------
BATCH = 2
CHANNELS = 3
IMG = 16
PATCH = 8
GRID_HW = IMG // PATCH            # 2
NUM_PATCHES = GRID_HW * GRID_HW   # 4
SEQ = NUM_PATCHES + 1             # 5  (cls token + patches)
EMBED = 32                        # vision_embed_dim_
HEADS = 4                         # vision_heads_
HEAD_DIM = EMBED // HEADS         # 8
WIDTH = 64                        # vision_width_ (MLP intermediate)
LAYERS = 2                        # vision_layers_
PATCH_DIM = CHANNELS * PATCH * PATCH  # 192
EPS = 1e-5
SCALE = HEAD_DIM ** (-0.5)


# ----------------------------- shared math helpers ---------------------------
def _ln(x, w, b):
    mu = jnp.mean(x, axis=-1, keepdims=True)
    var = jnp.mean(jnp.square(x - mu), axis=-1, keepdims=True)
    return (x - mu) * lax.rsqrt(var + EPS) * w + b


def _gelu(x):
    # exact GELU (matches torch.nn.GELU default)
    return 0.5 * x * (1.0 + lax.erf(x * (1.0 / math.sqrt(2.0))))


# ----------------------------- fused Pallas kernel ---------------------------
def fused_clip_kernel(patches_ref, convw_ref, cls_ref, pos_ref,
                      ln1w_ref, ln1b_ref, qkvw_ref, qkvb_ref, ow_ref, ob_ref,
                      ln2w_ref, ln2b_ref, f1w_ref, f1b_ref, f2w_ref, f2b_ref,
                      postw_ref, postb_ref,
                      hid_out_ref, pooled_out_ref,
                      hid_scr):
    """grid = (layer,). One encoder layer per step (all batch elements);
    hidden state carried in VMEM scratch; embedding fused at layer 0,
    HBM writeback + pooled post-LN fused at the last layer."""
    layer = pl.program_id(0)

    # --- layer 0: patch embedding + cls + position, written straight to VMEM
    @pl.when(layer == 0)
    def _init():
        for b in range(BATCH):
            pe = jnp.dot(patches_ref[b], convw_ref[...],
                         preferred_element_type=jnp.float32)        # (Np, D)
            hid_scr[b, 0:1, :] = cls_ref[...] + pos_ref[0:1, :]     # cls row
            hid_scr[b, 1:, :] = pe + pos_ref[1:, :]                 # patch rows

    # per-layer parameters (scale already folded into the Q block of qkvw/qkvb)
    ln1w, ln1b = ln1w_ref[0], ln1b_ref[0]
    qkvw, qkvb = qkvw_ref[0], qkvb_ref[0]
    ow, ob = ow_ref[0], ob_ref[0]
    ln2w, ln2b = ln2w_ref[0], ln2b_ref[0]
    f1w, f1b = f1w_ref[0], f1b_ref[0]
    f2w, f2b = f2w_ref[0], f2b_ref[0]

    for b in range(BATCH):                                          # unrolled, B tiny
        x = hid_scr[b]                                              # (S, D) f32

        # --- pre-LN + self attention (fused QKV, head-batched) ---
        h1 = _ln(x, ln1w, ln1b)
        qkv = jnp.dot(h1, qkvw, preferred_element_type=jnp.float32) + qkvb
        q = qkv[:, 0 * EMBED:1 * EMBED]                             # pre-scaled
        k = qkv[:, 1 * EMBED:2 * EMBED]
        v = qkv[:, 2 * EMBED:3 * EMBED]

        qh = jnp.stack([q[:, h * HEAD_DIM:(h + 1) * HEAD_DIM] for h in range(HEADS)], axis=0)
        kh = jnp.stack([k[:, h * HEAD_DIM:(h + 1) * HEAD_DIM] for h in range(HEADS)], axis=0)
        vh = jnp.stack([v[:, h * HEAD_DIM:(h + 1) * HEAD_DIM] for h in range(HEADS)], axis=0)

        scores = jnp.einsum("hqd,hkd->hqk", qh, kh,
                            preferred_element_type=jnp.float32)     # (H,S,S)
        scores = scores - jnp.max(scores, axis=-1, keepdims=True)
        e = jnp.exp(scores)
        probs = e * pl.reciprocal(jnp.sum(e, axis=-1, keepdims=True), approx=True)
        ctx = jnp.einsum("hqk,hkd->hqd", probs, vh,
                         preferred_element_type=jnp.float32)        # (H,S,hd)
        ctx = jnp.concatenate([ctx[h] for h in range(HEADS)], axis=-1)  # (S, D)
        attn = jnp.dot(ctx, ow, preferred_element_type=jnp.float32) + ob
        x = x + attn                                                # residual 1

        # --- pre-LN + MLP ---
        h2 = _ln(x, ln2w, ln2b)
        m = jnp.dot(h2, f1w, preferred_element_type=jnp.float32) + f1b
        m = _gelu(m)
        x = x + jnp.dot(m, f2w, preferred_element_type=jnp.float32) + f2b

        hid_scr[b] = x                                              # carry

        # --- last layer: single HBM writeback + fused pooled post-LN ---
        @pl.when(layer == LAYERS - 1)
        def _finish():
            hid_out_ref[b] = x.astype(hid_out_ref.dtype)
            pooled_out_ref[b] = _ln(x[0:1, :], postw_ref[...],
                                    postb_ref[...]).astype(pooled_out_ref.dtype)


# ----------------------------- wrapper ----------------------------------------
def _stack_layer_params(layers):
    stk = lambda name: jnp.stack([lp[name] for lp in layers], axis=0)
    # fold the attention scale into the Q block of the fused QKV weights/bias
    qkv_w = jnp.stack(
        [jnp.concatenate([lp["q_w"] * SCALE, lp["k_w"], lp["v_w"]], axis=1)
         for lp in layers], axis=0)                                  # (L, D, 3D)
    qkv_b = jnp.stack(
        [jnp.concatenate([lp["q_b"] * SCALE, lp["k_b"], lp["v_b"]], axis=1)
         for lp in layers], axis=0)                                  # (L, 1, 3D)
    return (stk("ln1_w"), stk("ln1_b"), qkv_w, qkv_b, stk("o_w"), stk("o_b"),
            stk("ln2_w"), stk("ln2_b"), stk("f1_w"), stk("f1_b"),
            stk("f2_w"), stk("f2_b"))


def clip_vision_transformer(pixel_values, params):
    B = pixel_values.shape[0]
    assert B == BATCH
    # im2col glue: NCHW -> (B, num_patches, C*p*p), ordered (c, kh, kw) like conv2d
    patches = pixel_values.reshape(B, CHANNELS, GRID_HW, PATCH, GRID_HW, PATCH)
    patches = patches.transpose(0, 2, 4, 1, 3, 5).reshape(B, NUM_PATCHES, PATCH_DIM)
    conv_w = params["conv_w"].reshape(EMBED, PATCH_DIM).T            # (Pd, D)
    cls2d = params["cls"].reshape(1, EMBED)
    stacked = _stack_layer_params(params["layers"])

    lyr = lambda r, c: pl.BlockSpec((1, r, c), lambda l: (l, 0, 0))  # per-layer
    cst = lambda r, c: pl.BlockSpec((r, c), lambda l: (0, 0))        # constant

    in_specs = [
        pl.BlockSpec((B, NUM_PATCHES, PATCH_DIM), lambda l: (0, 0, 0)),  # patches
        cst(PATCH_DIM, EMBED),                        # conv weight (flat)
        cst(1, EMBED),                                # cls embedding
        cst(SEQ, EMBED),                              # position embedding
        lyr(1, EMBED), lyr(1, EMBED),                 # ln1 w/b
        lyr(EMBED, 3 * EMBED), lyr(1, 3 * EMBED),     # fused qkv w/b (q pre-scaled)
        lyr(EMBED, EMBED), lyr(1, EMBED),             # out-proj w/b
        lyr(1, EMBED), lyr(1, EMBED),                 # ln2 w/b
        lyr(EMBED, WIDTH), lyr(1, WIDTH),             # fc1 w/b
        lyr(WIDTH, EMBED), lyr(1, EMBED),             # fc2 w/b
        cst(1, EMBED), cst(1, EMBED),                 # post-LN w/b
    ]
    out_specs = (
        pl.BlockSpec((B, SEQ, EMBED), lambda l: (0, 0, 0)),
        pl.BlockSpec((B, 1, EMBED), lambda l: (0, 0, 0)),
    )

    last_hidden, pooled = pl.pallas_call(
        fused_clip_kernel,
        out_shape=(jax.ShapeDtypeStruct((B, SEQ, EMBED), jnp.float32),
                   jax.ShapeDtypeStruct((B, 1, EMBED), jnp.float32)),
        grid=(LAYERS,),
        in_specs=in_specs,
        out_specs=out_specs,
        scratch_shapes=[pltpu.VMEM((B, SEQ, EMBED), jnp.float32)],
        compiler_params=pltpu.CompilerParams(
            dimension_semantics=("arbitrary",)),
    )(patches, conv_w, cls2d, params["pos"], *stacked,
      params["post_ln_w"], params["post_ln_b"])

    return {"last_hidden_state": last_hidden, "pooled_output": pooled[:, 0, :]}


# ----------------------------- parameter init ---------------------------------
def init_params(key):
    keys = list(jax.random.split(key, 8 + LAYERS * 10))
    it = iter(keys)

    def nrm(shape, scale=0.02):
        return jax.random.normal(next(it), shape, jnp.float32) * scale

    params = {
        "conv_w": nrm((EMBED, CHANNELS, PATCH, PATCH)),
        "cls": nrm((1, 1, EMBED), 1.0),          # torch.randn
        "pos": nrm((SEQ, EMBED)),
        "post_ln_w": jnp.ones((1, EMBED), jnp.float32),
        "post_ln_b": jnp.zeros((1, EMBED), jnp.float32),
        "layers": [],
    }
    for _ in range(LAYERS):
        params["layers"].append(dict(
            ln1_w=jnp.ones((1, EMBED), jnp.float32),
            ln1_b=jnp.zeros((1, EMBED), jnp.float32),
            q_w=nrm((EMBED, EMBED)), q_b=nrm((1, EMBED)),
            k_w=nrm((EMBED, EMBED)), k_b=nrm((1, EMBED)),
            v_w=nrm((EMBED, EMBED)), v_b=nrm((1, EMBED)),
            o_w=nrm((EMBED, EMBED)), o_b=nrm((1, EMBED)),
            ln2_w=jnp.ones((1, EMBED), jnp.float32),
            ln2_b=jnp.zeros((1, EMBED), jnp.float32),
            f1_w=nrm((EMBED, WIDTH)), f1_b=nrm((1, WIDTH)),
            f2_w=nrm((WIDTH, EMBED)), f2_b=nrm((1, EMBED)),
        ))
    return params


# ----------------------------- pure-JAX reference ------------------------------
def reference_forward(pixel_values, params):
    B = pixel_values.shape[0]
    patches = pixel_values.reshape(B, CHANNELS, GRID_HW, PATCH, GRID_HW, PATCH)
    patches = patches.transpose(0, 2, 4, 1, 3, 5).reshape(B, NUM_PATCHES, PATCH_DIM)
    w_flat = params["conv_w"].reshape(EMBED, PATCH_DIM).T
    pe = patches @ w_flat
    cls = jnp.broadcast_to(params["cls"].reshape(1, 1, EMBED), (B, 1, EMBED))
    h = jnp.concatenate([cls, pe], axis=1) + params["pos"][None]

    for lp in params["layers"]:
        r = h
        x = _ln(h, lp["ln1_w"][0], lp["ln1_b"][0])
        q = x @ lp["q_w"] + lp["q_b"][0]
        k = x @ lp["k_w"] + lp["k_b"][0]
        v = x @ lp["v_w"] + lp["v_b"][0]
        q = q.reshape(B, SEQ, HEADS, HEAD_DIM).transpose(0, 2, 1, 3)
        k = k.reshape(B, SEQ, HEADS, HEAD_DIM).transpose(0, 2, 1, 3)
        v = v.reshape(B, SEQ, HEADS, HEAD_DIM).transpose(0, 2, 1, 3)
        scores = jnp.einsum("bhqd,bhkd->bhqk", q, k) * SCALE
        probs = jax.nn.softmax(scores, axis=-1)
        ctx = jnp.einsum("bhqk,bhkd->bhqd", probs, v)
        ctx = ctx.transpose(0, 2, 1, 3).reshape(B, SEQ, EMBED)
        h = r + (ctx @ lp["o_w"] + lp["o_b"][0])
        r = h
        x = _ln(h, lp["ln2_w"][0], lp["ln2_b"][0])
        m = _gelu(x @ lp["f1_w"] + lp["f1_b"][0])
        h = r + (m @ lp["f2_w"] + lp["f2_b"][0])

    pooled = _ln(h[:, 0, :], params["post_ln_w"][0], params["post_ln_b"][0])
    return h, pooled


# ----------------------------- main --------------------------------------------
if __name__ == "__main__":
    key = jax.random.PRNGKey(0)
    pkey, xkey = jax.random.split(key)
    params = init_params(pkey)
    pixel_values = jax.random.normal(xkey, (BATCH, CHANNELS, IMG, IMG), jnp.float32)

    fwd = jax.jit(clip_vision_transformer)
    out = fwd(pixel_values, params)
    jax.block_until_ready(out)

    ref_last, ref_pooled = reference_forward(pixel_values, params)
    # slightly relaxed tolerance: softmax denom uses the EUP approx reciprocal
    np.testing.assert_allclose(np.asarray(out["last_hidden_state"]),
                               np.asarray(ref_last), rtol=5e-3, atol=2e-3)
    np.testing.assert_allclose(np.asarray(out["pooled_output"]),
                               np.asarray(ref_pooled), rtol=5e-3, atol=2e-3)

    print("KERNEL_OK")
</pallas_src>

<mosaic_0001>
module attributes {stable_mosaic.version = 11 : i64} {
  func.func @fused_clip_kernel(%arg0: i32, %arg1: memref<2x4x192xf32, #tpu.memory_space<vmem>>, %arg2: memref<192x32xf32, #tpu.memory_space<vmem>>, %arg3: memref<1x32xf32, #tpu.memory_space<vmem>>, %arg4: memref<5x32xf32, #tpu.memory_space<vmem>>, %arg5: memref<1x1x32xf32, #tpu.memory_space<vmem>>, %arg6: memref<1x1x32xf32, #tpu.memory_space<vmem>>, %arg7: memref<1x32x96xf32, #tpu.memory_space<vmem>>, %arg8: memref<1x1x96xf32, #tpu.memory_space<vmem>>, %arg9: memref<1x32x32xf32, #tpu.memory_space<vmem>>, %arg10: memref<1x1x32xf32, #tpu.memory_space<vmem>>, %arg11: memref<1x1x32xf32, #tpu.memory_space<vmem>>, %arg12: memref<1x1x32xf32, #tpu.memory_space<vmem>>, %arg13: memref<1x32x64xf32, #tpu.memory_space<vmem>>, %arg14: memref<1x1x64xf32, #tpu.memory_space<vmem>>, %arg15: memref<1x64x32xf32, #tpu.memory_space<vmem>>, %arg16: memref<1x1x32xf32, #tpu.memory_space<vmem>>, %arg17: memref<1x32xf32, #tpu.memory_space<vmem>>, %arg18: memref<1x32xf32, #tpu.memory_space<vmem>>, %arg19: memref<2x5x32xf32, #tpu.memory_space<vmem>>, %arg20: memref<2x1x32xf32, #tpu.memory_space<vmem>>, %arg21: memref<2x5x32xf32, #tpu.memory_space<vmem>>) attributes {dimension_semantics = [#tpu.dimension_semantics<arbitrary>], iteration_bounds = array<i64: 2>, scalar_prefetch = 0 : i64, scratch_operands = 1 : i64, tpu.core_type = #tpu.core_type<tc>, window_params = [{pipeline_mode = #tpu.pipeline_mode<synchronous>, transform_indices = @transform_0, window_bounds = array<i64: 2, 4, 192>}, {pipeline_mode = #tpu.pipeline_mode<synchronous>, transform_indices = @transform_1, window_bounds = array<i64: 192, 32>}, {pipeline_mode = #tpu.pipeline_mode<synchronous>, transform_indices = @transform_2, window_bounds = array<i64: 1, 32>}, {pipeline_mode = #tpu.pipeline_mode<synchronous>, transform_indices = @transform_3, window_bounds = array<i64: 5, 32>}, {transform_indices = @transform_4, window_bounds = array<i64: 1, 1, 32>}, {transform_indices = @transform_5, window_bounds = array<i64: 1, 1, 32>}, {transform_indices = @transform_6, window_bounds = array<i64: 1, 32, 96>}, {transform_indices = @transform_7, window_bounds = array<i64: 1, 1, 96>}, {transform_indices = @transform_8, window_bounds = array<i64: 1, 32, 32>}, {transform_indices = @transform_9, window_bounds = array<i64: 1, 1, 32>}, {transform_indices = @transform_10, window_bounds = array<i64: 1, 1, 32>}, {transform_indices = @transform_11, window_bounds = array<i64: 1, 1, 32>}, {transform_indices = @transform_12, window_bounds = array<i64: 1, 32, 64>}, {transform_indices = @transform_13, window_bounds = array<i64: 1, 1, 64>}, {transform_indices = @transform_14, window_bounds = array<i64: 1, 64, 32>}, {transform_indices = @transform_15, window_bounds = array<i64: 1, 1, 32>}, {pipeline_mode = #tpu.pipeline_mode<synchronous>, transform_indices = @transform_16, window_bounds = array<i64: 1, 32>}, {pipeline_mode = #tpu.pipeline_mode<synchronous>, transform_indices = @transform_17, window_bounds = array<i64: 1, 32>}, {pipeline_mode = #tpu.pipeline_mode<synchronous>, transform_indices = @transform_18, window_bounds = array<i64: 2, 5, 32>}, {pipeline_mode = #tpu.pipeline_mode<synchronous>, transform_indices = @transform_19, window_bounds = array<i64: 2, 1, 32>}]} {
    %c0_i32 = arith.constant 0 : i32
    %0 = arith.cmpi eq, %arg0, %c0_i32 : i32
    %1 = arith.extui %0 : i1 to i32
    %c0_i32_0 = arith.constant 0 : i32
    %2 = arith.cmpi ne, %1, %c0_i32_0 : i32
    scf.if %2 {
      %c0_91 = arith.constant 0 : index
      %c0_92 = arith.constant 0 : index
      %c0_93 = arith.constant 0 : index
      %277 = vector.load %arg1[%c0_91, %c0_92, %c0_93] : memref<2x4x192xf32, #tpu.memory_space<vmem>>, vector<1x4x192xf32>
      %278 = vector.shape_cast %277 : vector<1x4x192xf32> to vector<4x192xf32>
      %c0_94 = arith.constant 0 : index
      %c0_95 = arith.constant 0 : index
      %279 = vector.load %arg2[%c0_94, %c0_95] : memref<192x32xf32, #tpu.memory_space<vmem>>, vector<192x32xf32>
      %cst_96 = arith.constant dense<0.000000e+00> : vector<4x32xf32>
      %280 = tpu.matmul %278, %279, %cst_96 {dimension_numbers = #tpu.dot_dimension_numbers<[1], [0], [0], [1], [0, 0, 1, 1], [], []>} : vector<4x192xf32>, vector<192x32xf32>, vector<4x32xf32> -> vector<4x32xf32>
      %c0_97 = arith.constant 0 : index
      %c0_98 = arith.constant 0 : index
      %281 = vector.load %arg3[%c0_97, %c0_98] : memref<1x32xf32, #tpu.memory_space<vmem>>, vector<1x32xf32>
      %c0_99 = arith.constant 0 : index
      %c0_100 = arith.constant 0 : index
      %282 = vector.load %arg4[%c0_99, %c0_100] : memref<5x32xf32, #tpu.memory_space<vmem>>, vector<1x32xf32>
      %283 = arith.addf %281, %282 : vector<1x32xf32>
      %c0_101 = arith.constant 0 : index
      %c0_102 = arith.constant 0 : index
      %c0_103 = arith.constant 0 : index
      %284 = vector.load %arg21[%c0_101, %c0_102, %c0_103] : memref<2x5x32xf32, #tpu.memory_space<vmem>>, vector<1x1x32xf32>
      %285 = vector.shape_cast %284 : vector<1x1x32xf32> to vector<1x32xf32>
      %286 = vector.shape_cast %283 : vector<1x32xf32> to vector<1x1x32xf32>
      tpu.vector_store %arg21[%c0_101, %c0_102, %c0_103], %286 {strides = array<i32>} : memref<2x5x32xf32, #tpu.memory_space<vmem>>, vector<1x1x32xf32>,
      %c1_104 = arith.constant 1 : index
      %c0_105 = arith.constant 0 : index
      %287 = vector.load %arg4[%c1_104, %c0_105] : memref<5x32xf32, #tpu.memory_space<vmem>>, vector<4x32xf32>
      %288 = arith.addf %280, %287 : vector<4x32xf32>
      %c0_106 = arith.constant 0 : index
      %c1_107 = arith.constant 1 : index
      %c0_108 = arith.constant 0 : index
      %289 = vector.load %arg21[%c0_106, %c1_107, %c0_108] : memref<2x5x32xf32, #tpu.memory_space<vmem>>, vector<1x4x32xf32>
      %290 = vector.shape_cast %289 : vector<1x4x32xf32> to vector<4x32xf32>
      %291 = vector.shape_cast %288 : vector<4x32xf32> to vector<1x4x32xf32>
      tpu.vector_store %arg21[%c0_106, %c1_107, %c0_108], %291 {strides = array<i32>} : memref<2x5x32xf32, #tpu.memory_space<vmem>>, vector<1x4x32xf32>,
      %c1_109 = arith.constant 1 : index
      %c0_110 = arith.constant 0 : index
      %c0_111 = arith.constant 0 : index
      %292 = vector.load %arg1[%c1_109, %c0_110, %c0_111] : memref<2x4x192xf32, #tpu.memory_space<vmem>>, vector<1x4x192xf32>
      %293 = vector.shape_cast %292 : vector<1x4x192xf32> to vector<4x192xf32>
      %c0_112 = arith.constant 0 : index
      %c0_113 = arith.constant 0 : index
      %294 = vector.load %arg2[%c0_112, %c0_113] : memref<192x32xf32, #tpu.memory_space<vmem>>, vector<192x32xf32>
      %cst_114 = arith.constant dense<0.000000e+00> : vector<4x32xf32>
      %295 = tpu.matmul %293, %294, %cst_114 {dimension_numbers = #tpu.dot_dimension_numbers<[1], [0], [0], [1], [0, 0, 1, 1], [], []>} : vector<4x192xf32>, vector<192x32xf32>, vector<4x32xf32> -> vector<4x32xf32>
      %c0_115 = arith.constant 0 : index
      %c0_116 = arith.constant 0 : index
      %296 = vector.load %arg3[%c0_115, %c0_116] : memref<1x32xf32, #tpu.memory_space<vmem>>, vector<1x32xf32>
      %c0_117 = arith.constant 0 : index
      %c0_118 = arith.constant 0 : index
      %297 = vector.load %arg4[%c0_117, %c0_118] : memref<5x32xf32, #tpu.memory_space<vmem>>, vector<1x32xf32>
      %298 = arith.addf %296, %297 : vector<1x32xf32>
      %c1_119 = arith.constant 1 : index
      %c0_120 = arith.constant 0 : index
      %c0_121 = arith.constant 0 : index
      %299 = vector.load %arg21[%c1_119, %c0_120, %c0_121] : memref<2x5x32xf32, #tpu.memory_space<vmem>>, vector<1x1x32xf32>
      %300 = vector.shape_cast %299 : vector<1x1x32xf32> to vector<1x32xf32>
      %301 = vector.shape_cast %298 : vector<1x32xf32> to vector<1x1x32xf32>
      tpu.vector_store %arg21[%c1_119, %c0_120, %c0_121], %301 {strides = array<i32>} : memref<2x5x32xf32, #tpu.memory_space<vmem>>, vector<1x1x32xf32>,
      %c1_122 = arith.constant 1 : index
      %c0_123 = arith.constant 0 : index
      %302 = vector.load %arg4[%c1_122, %c0_123] : memref<5x32xf32, #tpu.memory_space<vmem>>, vector<4x32xf32>
      %303 = arith.addf %295, %302 : vector<4x32xf32>
      %c1_124 = arith.constant 1 : index
      %c1_125 = arith.constant 1 : index
      %c0_126 = arith.constant 0 : index
      %304 = vector.load %arg21[%c1_124, %c1_125, %c0_126] : memref<2x5x32xf32, #tpu.memory_space<vmem>>, vector<1x4x32xf32>
      %305 = vector.shape_cast %304 : vector<1x4x32xf32> to vector<4x32xf32>
      %306 = vector.shape_cast %303 : vector<4x32xf32> to vector<1x4x32xf32>
      tpu.vector_store %arg21[%c1_124, %c1_125, %c0_126], %306 {strides = array<i32>} : memref<2x5x32xf32, #tpu.memory_space<vmem>>, vector<1x4x32xf32>,
    } else {
    }
    %c0 = arith.constant 0 : index
    %c0_1 = arith.constant 0 : index
    %c0_2 = arith.constant 0 : index
    %3 = vector.load %arg5[%c0, %c0_1, %c0_2] : memref<1x1x32xf32, #tpu.memory_space<vmem>>, vector<1x1x32xf32>
    %4 = vector.shape_cast %3 : vector<1x1x32xf32> to vector<1x32xf32>
    %c0_3 = arith.constant 0 : index
    %c0_4 = arith.constant 0 : index
    %c0_5 = arith.constant 0 : index
    %5 = vector.load %arg6[%c0_3, %c0_4, %c0_5] : memref<1x1x32xf32, #tpu.memory_space<vmem>>, vector<1x1x32xf32>
    %6 = vector.shape_cast %5 : vector<1x1x32xf32> to vector<1x32xf32>
    %c0_6 = arith.constant 0 : index
    %c0_7 = arith.constant 0 : index
    %c0_8 = arith.constant 0 : index
    %7 = vector.load %arg7[%c0_6, %c0_7, %c0_8] : memref<1x32x96xf32, #tpu.memory_space<vmem>>, vector<1x32x96xf32>
    %8 = vector.shape_cast %7 : vector<1x32x96xf32> to vector<32x96xf32>
    %c0_9 = arith.constant 0 : index
    %c0_10 = arith.constant 0 : index
    %c0_11 = arith.constant 0 : index
    %9 = vector.load %arg8[%c0_9, %c0_10, %c0_11] : memref<1x1x96xf32, #tpu.memory_space<vmem>>, vector<1x1x96xf32>
    %10 = vector.shape_cast %9 : vector<1x1x96xf32> to vector<1x96xf32>
    %c0_12 = arith.constant 0 : index
    %c0_13 = arith.constant 0 : index
    %c0_14 = arith.constant 0 : index
    %11 = vector.load %arg9[%c0_12, %c0_13, %c0_14] : memref<1x32x32xf32, #tpu.memory_space<vmem>>, vector<1x32x32xf32>
    %12 = vector.shape_cast %11 : vector<1x32x32xf32> to vector<32x32xf32>
    %c0_15 = arith.constant 0 : index
    %c0_16 = arith.constant 0 : index
    %c0_17 = arith.constant 0 : index
    %13 = vector.load %arg10[%c0_15, %c0_16, %c0_17] : memref<1x1x32xf32, #tpu.memory_space<vmem>>, vector<1x1x32xf32>
    %14 = vector.shape_cast %13 : vector<1x1x32xf32> to vector<1x32xf32>
    %c0_18 = arith.constant 0 : index
    %c0_19 = arith.constant 0 : index
    %c0_20 = arith.constant 0 : index
    %15 = vector.load %arg11[%c0_18, %c0_19, %c0_20] : memref<1x1x32xf32, #tpu.memory_space<vmem>>, vector<1x1x32xf32>
    %16 = vector.shape_cast %15 : vector<1x1x32xf32> to vector<1x32xf32>
    %c0_21 = arith.constant 0 : index
    %c0_22 = arith.constant 0 : index
    %c0_23 = arith.constant 0 : index
    %17 = vector.load %arg12[%c0_21, %c0_22, %c0_23] : memref<1x1x32xf32, #tpu.memory_space<vmem>>, vector<1x1x32xf32>
    %18 = vector.shape_cast %17 : vector<1x1x32xf32> to vector<1x32xf32>
    %c0_24 = arith.constant 0 : index
    %c0_25 = arith.constant 0 : index
    %c0_26 = arith.constant 0 : index
    %19 = vector.load %arg13[%c0_24, %c0_25, %c0_26] : memref<1x32x64xf32, #tpu.memory_space<vmem>>, vector<1x32x64xf32>
    %20 = vector.shape_cast %19 : vector<1x32x64xf32> to vector<32x64xf32>
    %c0_27 = arith.constant 0 : index
    %c0_28 = arith.constant 0 : index
    %c0_29 = arith.constant 0 : index
    %21 = vector.load %arg14[%c0_27, %c0_28, %c0_29] : memref<1x1x64xf32, #tpu.memory_space<vmem>>, vector<1x1x64xf32>
    %22 = vector.shape_cast %21 : vector<1x1x64xf32> to vector<1x64xf32>
    %c0_30 = arith.constant 0 : index
    %c0_31 = arith.constant 0 : index
    %c0_32 = arith.constant 0 : index
    %23 = vector.load %arg15[%c0_30, %c0_31, %c0_32] : memref<1x64x32xf32, #tpu.memory_space<vmem>>, vector<1x64x32xf32>
    %24 = vector.shape_cast %23 : vector<1x64x32xf32> to vector<64x32xf32>
    %c0_33 = arith.constant 0 : index
    %c0_34 = arith.constant 0 : index
    %c0_35 = arith.constant 0 : index
    %25 = vector.load %arg16[%c0_33, %c0_34, %c0_35] : memref<1x1x32xf32, #tpu.memory_space<vmem>>, vector<1x1x32xf32>
    %26 = vector.shape_cast %25 : vector<1x1x32xf32> to vector<1x32xf32>
    %c0_36 = arith.constant 0 : index
    %c0_37 = arith.constant 0 : index
    %c0_38 = arith.constant 0 : index
    %27 = vector.load %arg21[%c0_36, %c0_37, %c0_38] : memref<2x5x32xf32, #tpu.memory_space<vmem>>, vector<1x5x32xf32>
    %28 = vector.shape_cast %27 : vector<1x5x32xf32> to vector<5x32xf32>
    %cst = arith.constant dense<0.000000e+00> : vector<5xf32>
    %29 = vector.multi_reduction <add>, %28, %cst [1] : vector<5x32xf32> to vector<5xf32>
    %30 = vector.shape_cast %29 : vector<5xf32> to vector<5x1xf32>
    %cst_39 = arith.constant 3.200000e+01 : f32
    %31 = vector.broadcast %cst_39 : f32 to vector<5x1xf32>
    %32 = arith.divf %30, %31 : vector<5x1xf32>
    %33 = vector.broadcast %32 : vector<5x1xf32> to vector<5x32xf32>
    %34 = arith.subf %28, %33 : vector<5x32xf32>
    %35 = arith.mulf %34, %34 : vector<5x32xf32>
    %cst_40 = arith.constant dense<0.000000e+00> : vector<5xf32>
    %36 = vector.multi_reduction <add>, %35, %cst_40 [1] : vector<5x32xf32> to vector<5xf32>
    %37 = vector.shape_cast %36 : vector<5xf32> to vector<5x1xf32>
    %cst_41 = arith.constant 3.200000e+01 : f32
    %38 = vector.broadcast %cst_41 : f32 to vector<5x1xf32>
    %39 = arith.divf %37, %38 : vector<5x1xf32>
    %40 = vector.broadcast %32 : vector<5x1xf32> to vector<5x32xf32>
    %41 = arith.subf %28, %40 : vector<5x32xf32>
    %cst_42 = arith.constant 9.99999974E-6 : f32
    %42 = vector.broadcast %cst_42 : f32 to vector<5x1xf32>
    %43 = arith.addf %39, %42 : vector<5x1xf32>
    %44 = math.rsqrt %43 : vector<5x1xf32>
    %45 = vector.broadcast %44 : vector<5x1xf32> to vector<5x32xf32>
    %46 = arith.mulf %41, %45 : vector<5x32xf32>
    %47 = vector.broadcast %4 : vector<1x32xf32> to vector<5x32xf32>
    %48 = arith.mulf %46, %47 : vector<5x32xf32>
    %49 = vector.broadcast %6 : vector<1x32xf32> to vector<5x32xf32>
    %50 = arith.addf %48, %49 : vector<5x32xf32>
    %cst_43 = arith.constant dense<0.000000e+00> : vector<5x96xf32>
    %51 = tpu.matmul %50, %8, %cst_43 {dimension_numbers = #tpu.dot_dimension_numbers<[1], [0], [0], [1], [0, 0, 1, 1], [], []>} : vector<5x32xf32>, vector<32x96xf32>, vector<5x96xf32> -> vector<5x96xf32>
    %52 = vector.broadcast %10 : vector<1x96xf32> to vector<5x96xf32>
    %53 = arith.addf %51, %52 : vector<5x96xf32>
    %54 = vector.extract_strided_slice %53 {offsets = [0, 0], sizes = [5, 32], strides = [1, 1]} : vector<5x96xf32> to vector<5x32xf32>
    %55 = vector.extract_strided_slice %53 {offsets = [0, 32], sizes = [5, 32], strides = [1, 1]} : vector<5x96xf32> to vector<5x32xf32>
    %56 = vector.extract_strided_slice %53 {offsets = [0, 64], sizes = [5, 32], strides = [1, 1]} : vector<5x96xf32> to vector<5x32xf32>
    %57 = vector.extract_strided_slice %54 {offsets = [0, 0], sizes = [5, 8], strides = [1, 1]} : vector<5x32xf32> to vector<5x8xf32>
    %58 = vector.extract_strided_slice %54 {offsets = [0, 8], sizes = [5, 8], strides = [1, 1]} : vector<5x32xf32> to vector<5x8xf32>
    %59 = vector.extract_strided_slice %54 {offsets = [0, 16], sizes = [5, 8], strides = [1, 1]} : vector<5x32xf32> to vector<5x8xf32>
    %60 = vector.extract_strided_slice %54 {offsets = [0, 24], sizes = [5, 8], strides = [1, 1]} : vector<5x32xf32> to vector<5x8xf32>
    %61 = vector.shape_cast %57 : vector<5x8xf32> to vector<1x5x8xf32>
    %62 = vector.shape_cast %58 : vector<5x8xf32> to vector<1x5x8xf32>
    %63 = vector.shape_cast %59 : vector<5x8xf32> to vector<1x5x8xf32>
    %64 = vector.shape_cast %60 : vector<5x8xf32> to vector<1x5x8xf32>
    %65 = tpu.concatenate %61, %62, %63, %64 in 0 : vector<1x5x8xf32>, vector<1x5x8xf32>, vector<1x5x8xf32>, vector<1x5x8xf32> -> vector<4x5x8xf32>
    %66 = vector.extract_strided_slice %55 {offsets = [0, 0], sizes = [5, 8], strides = [1, 1]} : vector<5x32xf32> to vector<5x8xf32>
    %67 = vector.extract_strided_slice %55 {offsets = [0, 8], sizes = [5, 8], strides = [1, 1]} : vector<5x32xf32> to vector<5x8xf32>
    %68 = vector.extract_strided_slice %55 {offsets = [0, 16], sizes = [5, 8], strides = [1, 1]} : vector<5x32xf32> to vector<5x8xf32>
    %69 = vector.extract_strided_slice %55 {offsets = [0, 24], sizes = [5, 8], strides = [1, 1]} : vector<5x32xf32> to vector<5x8xf32>
    %70 = vector.shape_cast %66 : vector<5x8xf32> to vector<1x5x8xf32>
    %71 = vector.shape_cast %67 : vector<5x8xf32> to vector<1x5x8xf32>
    %72 = vector.shape_cast %68 : vector<5x8xf32> to vector<1x5x8xf32>
    %73 = vector.shape_cast %69 : vector<5x8xf32> to vector<1x5x8xf32>
    %74 = tpu.concatenate %70, %71, %72, %73 in 0 : vector<1x5x8xf32>, vector<1x5x8xf32>, vector<1x5x8xf32>, vector<1x5x8xf32> -> vector<4x5x8xf32>
    %75 = vector.extract_strided_slice %56 {offsets = [0, 0], sizes = [5, 8], strides = [1, 1]} : vector<5x32xf32> to vector<5x8xf32>
    %76 = vector.extract_strided_slice %56 {offsets = [0, 8], sizes = [5, 8], strides = [1, 1]} : vector<5x32xf32> to vector<5x8xf32>
    %77 = vector.extract_strided_slice %56 {offsets = [0, 16], sizes = [5, 8], strides = [1, 1]} : vector<5x32xf32> to vector<5x8xf32>
    %78 = vector.extract_strided_slice %56 {offsets = [0, 24], sizes = [5, 8], strides = [1, 1]} : vector<5x32xf32> to vector<5x8xf32>
    %79 = vector.shape_cast %75 : vector<5x8xf32> to vector<1x5x8xf32>
    %80 = vector.shape_cast %76 : vector<5x8xf32> to vector<1x5x8xf32>
    %81 = vector.shape_cast %77 : vector<5x8xf32> to vector<1x5x8xf32>
    %82 = vector.shape_cast %78 : vector<5x8xf32> to vector<1x5x8xf32>
    %83 = tpu.concatenate %79, %80, %81, %82 in 0 : vector<1x5x8xf32>, vector<1x5x8xf32>, vector<1x5x8xf32>, vector<1x5x8xf32> -> vector<4x5x8xf32>
    "tpu.trace_start"() <{level = 10 : i32, message = "hqd,hkd->hqk"}> : () -> ()
    %cst_44 = arith.constant dense<0.000000e+00> : vector<4x5x5xf32>
    %84 = tpu.matmul %65, %74, %cst_44 {dimension_numbers = #tpu.dot_dimension_numbers<[2], [2], [1], [1], [0, 0, 0, 1, 1, 1], [0], [0]>} : vector<4x5x8xf32>, vector<4x5x8xf32>, vector<4x5x5xf32> -> vector<4x5x5xf32>
    "tpu.trace_stop"() : () -> ()
    %cst_45 = arith.constant dense<0xFF800000> : vector<4x5xf32>
    %85 = vector.multi_reduction <maximumf>, %84, %cst_45 [2] : vector<4x5x5xf32> to vector<4x5xf32>
    %86 = vector.shape_cast %85 : vector<4x5xf32> to vector<4x5x1xf32>
    %87 = vector.broadcast %86 : vector<4x5x1xf32> to vector<4x5x5xf32>
    %88 = arith.subf %84, %87 : vector<4x5x5xf32>
    %89 = math.exp %88 : vector<4x5x5xf32>
    %cst_46 = arith.constant dense<0.000000e+00> : vector<4x5xf32>
    %90 = vector.multi_reduction <add>, %89, %cst_46 [2] : vector<4x5x5xf32> to vector<4x5xf32>
    %91 = vector.shape_cast %90 : vector<4x5xf32> to vector<4x5x1xf32>
    %92 = tpu.reciprocal %91 {approx = true} : vector<4x5x1xf32> -> vector<4x5x1xf32>
    %93 = vector.broadcast %92 : vector<4x5x1xf32> to vector<4x5x5xf32>
    %94 = arith.mulf %89, %93 : vector<4x5x5xf32>
    "tpu.trace_start"() <{level = 10 : i32, message = "hqk,hkd->hqd"}> : () -> ()
    %cst_47 = arith.constant dense<0.000000e+00> : vector<4x5x8xf32>
    %95 = tpu.matmul %94, %83, %cst_47 {dimension_numbers = #tpu.dot_dimension_numbers<[2], [1], [1], [2], [0, 0, 0, 1, 1, 2], [0], [0]>} : vector<4x5x5xf32>, vector<4x5x8xf32>, vector<4x5x8xf32> -> vector<4x5x8xf32>
    "tpu.trace_stop"() : () -> ()
    %96 = vector.extract_strided_slice %95 {offsets = [0, 0, 0], sizes = [1, 5, 8], strides = [1, 1, 1]} : vector<4x5x8xf32> to vector<1x5x8xf32>
    %97 = vector.shape_cast %96 : vector<1x5x8xf32> to vector<5x8xf32>
    %98 = vector.extract_strided_slice %95 {offsets = [1, 0, 0], sizes = [1, 5, 8], strides = [1, 1, 1]} : vector<4x5x8xf32> to vector<1x5x8xf32>
    %99 = vector.shape_cast %98 : vector<1x5x8xf32> to vector<5x8xf32>
    %100 = vector.extract_strided_slice %95 {offsets = [2, 0, 0], sizes = [1, 5, 8], strides = [1, 1, 1]} : vector<4x5x8xf32> to vector<1x5x8xf32>
    %101 = vector.shape_cast %100 : vector<1x5x8xf32> to vector<5x8xf32>
    %102 = vector.extract_strided_slice %95 {offsets = [3, 0, 0], sizes = [1, 5, 8], strides = [1, 1, 1]} : vector<4x5x8xf32> to vector<1x5x8xf32>
    %103 = vector.shape_cast %102 : vector<1x5x8xf32> to vector<5x8xf32>
    %104 = tpu.concatenate %97, %99, %101, %103 in 1 : vector<5x8xf32>, vector<5x8xf32>, vector<5x8xf32>, vector<5x8xf32> -> vector<5x32xf32>
    %cst_48 = arith.constant dense<0.000000e+00> : vector<5x32xf32>
    %105 = tpu.matmul %104, %12, %cst_48 {dimension_numbers = #tpu.dot_dimension_numbers<[1], [0], [0], [1], [0, 0, 1, 1], [], []>} : vector<5x32xf32>, vector<32x32xf32>, vector<5x32xf32> -> vector<5x32xf32>
    %106 = vector.broadcast %14 : vector<1x32xf32> to vector<5x32xf32>
    %107 = arith.addf %105, %106 : vector<5x32xf32>
    %108 = arith.addf %28, %107 : vector<5x32xf32>
    %cst_49 = arith.constant dense<0.000000e+00> : vector<5xf32>
    %109 = vector.multi_reduction <add>, %108, %cst_49 [1] : vector<5x32xf32> to vector<5xf32>
    %110 = vector.shape_cast %109 : vector<5xf32> to vector<5x1xf32>
    %cst_50 = arith.constant 3.200000e+01 : f32
    %111 = vector.broadcast %cst_50 : f32 to vector<5x1xf32>
    %112 = arith.divf %110, %111 : vector<5x1xf32>
    %113 = vector.broadcast %112 : vector<5x1xf32> to vector<5x32xf32>
    %114 = arith.subf %108, %113 : vector<5x32xf32>
    %115 = arith.mulf %114, %114 : vector<5x32xf32>
    %cst_51 = arith.constant dense<0.000000e+00> : vector<5xf32>
    %116 = vector.multi_reduction <add>, %115, %cst_51 [1] : vector<5x32xf32> to vector<5xf32>
    %117 = vector.shape_cast %116 : vector<5xf32> to vector<5x1xf32>
    %cst_52 = arith.constant 3.200000e+01 : f32
    %118 = vector.broadcast %cst_52 : f32 to vector<5x1xf32>
    %119 = arith.divf %117, %118 : vector<5x1xf32>
    %120 = vector.broadcast %112 : vector<5x1xf32> to vector<5x32xf32>
    %121 = arith.subf %108, %120 : vector<5x32xf32>
    %cst_53 = arith.constant 9.99999974E-6 : f32
    %122 = vector.broadcast %cst_53 : f32 to vector<5x1xf32>
    %123 = arith.addf %119, %122 : vector<5x1xf32>
    %124 = math.rsqrt %123 : vector<5x1xf32>
    %125 = vector.broadcast %124 : vector<5x1xf32> to vector<5x32xf32>
    %126 = arith.mulf %121, %125 : vector<5x32xf32>
    %127 = vector.broadcast %16 : vector<1x32xf32> to vector<5x32xf32>
    %128 = arith.mulf %126, %127 : vector<5x32xf32>
    %129 = vector.broadcast %18 : vector<1x32xf32> to vector<5x32xf32>
    %130 = arith.addf %128, %129 : vector<5x32xf32>
    %cst_54 = arith.constant dense<0.000000e+00> : vector<5x64xf32>
    %131 = tpu.matmul %130, %20, %cst_54 {dimension_numbers = #tpu.dot_dimension_numbers<[1], [0], [0], [1], [0, 0, 1, 1], [], []>} : vector<5x32xf32>, vector<32x64xf32>, vector<5x64xf32> -> vector<5x64xf32>
    %132 = vector.broadcast %22 : vector<1x64xf32> to vector<5x64xf32>
    %133 = arith.addf %131, %132 : vector<5x64xf32>
    %cst_55 = arith.constant 5.000000e-01 : f32
    %134 = vector.broadcast %cst_55 : f32 to vector<5x64xf32>
    %135 = arith.mulf %134, %133 : vector<5x64xf32>
    %cst_56 = arith.constant 0.707106769 : f32
    %136 = vector.broadcast %cst_56 : f32 to vector<5x64xf32>
    %137 = arith.mulf %133, %136 : vector<5x64xf32>
    %138 = math.erf %137 : vector<5x64xf32>
    %cst_57 = arith.constant 1.000000e+00 : f32
    %139 = vector.broadcast %cst_57 : f32 to vector<5x64xf32>
    %140 = arith.addf %139, %138 : vector<5x64xf32>
    %141 = arith.mulf %135, %140 : vector<5x64xf32>
    %cst_58 = arith.constant dense<0.000000e+00> : vector<5x32xf32>
    %142 = tpu.matmul %141, %24, %cst_58 {dimension_numbers = #tpu.dot_dimension_numbers<[1], [0], [0], [1], [0, 0, 1, 1], [], []>} : vector<5x64xf32>, vector<64x32xf32>, vector<5x32xf32> -> vector<5x32xf32>
    %143 = arith.addf %108, %142 : vector<5x32xf32>
    %144 = vector.broadcast %26 : vector<1x32xf32> to vector<5x32xf32>
    %145 = arith.addf %143, %144 : vector<5x32xf32>
    %c0_59 = arith.constant 0 : index
    %c0_60 = arith.constant 0 : index
    %c0_61 = arith.constant 0 : index
    %146 = vector.load %arg21[%c0_59, %c0_60, %c0_61] : memref<2x5x32xf32, #tpu.memory_space<vmem>>, vector<1x5x32xf32>
    %147 = vector.shape_cast %146 : vector<1x5x32xf32> to vector<5x32xf32>
    %148 = vector.shape_cast %145 : vector<5x32xf32> to vector<1x5x32xf32>
    tpu.vector_store %arg21[%c0_59, %c0_60, %c0_61], %148 {strides = array<i32>} : memref<2x5x32xf32, #tpu.memory_space<vmem>>, vector<1x5x32xf32>,
    %c1_i32 = arith.constant 1 : i32
    %149 = arith.cmpi eq, %arg0, %c1_i32 : i32
    %150 = arith.extui %149 : i1 to i32
    %c0_i32_62 = arith.constant 0 : i32
    %151 = arith.cmpi ne, %150, %c0_i32_62 : i32
    scf.if %151 {
      %c0_91 = arith.constant 0 : index
      %c0_92 = arith.constant 0 : index
      %c0_93 = arith.constant 0 : index
      %277 = vector.load %arg19[%c0_91, %c0_92, %c0_93] : memref<2x5x32xf32, #tpu.memory_space<vmem>>, vector<1x5x32xf32>
      %278 = vector.shape_cast %277 : vector<1x5x32xf32> to vector<5x32xf32>
      %279 = vector.shape_cast %145 : vector<5x32xf32> to vector<1x5x32xf32>
      tpu.vector_store %arg19[%c0_91, %c0_92, %c0_93], %279 {strides = array<i32>} : memref<2x5x32xf32, #tpu.memory_space<vmem>>, vector<1x5x32xf32>,
      %280 = vector.extract_strided_slice %145 {offsets = [0, 0], sizes = [1, 32], strides = [1, 1]} : vector<5x32xf32> to vector<1x32xf32>
      %c0_94 = arith.constant 0 : index
      %c0_95 = arith.constant 0 : index
      %281 = vector.load %arg17[%c0_94, %c0_95] : memref<1x32xf32, #tpu.memory_space<vmem>>, vector<1x32xf32>
      %c0_96 = arith.constant 0 : index
      %c0_97 = arith.constant 0 : index
      %282 = vector.load %arg18[%c0_96, %c0_97] : memref<1x32xf32, #tpu.memory_space<vmem>>, vector<1x32xf32>
      %cst_98 = arith.constant dense<0.000000e+00> : vector<1xf32>
      %283 = vector.multi_reduction <add>, %280, %cst_98 [1] : vector<1x32xf32> to vector<1xf32>
      %284 = vector.shape_cast %283 : vector<1xf32> to vector<1x1xf32>
      %cst_99 = arith.constant 3.200000e+01 : f32
      %285 = vector.broadcast %cst_99 : f32 to vector<1x1xf32>
      %286 = arith.divf %284, %285 : vector<1x1xf32>
      %287 = vector.broadcast %286 : vector<1x1xf32> to vector<1x32xf32>
      %288 = arith.subf %280, %287 : vector<1x32xf32>
      %289 = arith.mulf %288, %288 : vector<1x32xf32>
      %cst_100 = arith.constant dense<0.000000e+00> : vector<1xf32>
      %290 = vector.multi_reduction <add>, %289, %cst_100 [1] : vector<1x32xf32> to vector<1xf32>
      %291 = vector.shape_cast %290 : vector<1xf32> to vector<1x1xf32>
      %cst_101 = arith.constant 3.200000e+01 : f32
      %292 = vector.broadcast %cst_101 : f32 to vector<1x1xf32>
      %293 = arith.divf %291, %292 : vector<1x1xf32>
      %294 = vector.broadcast %286 : vector<1x1xf32> to vector<1x32xf32>
      %295 = arith.subf %280, %294 : vector<1x32xf32>
      %cst_102 = arith.constant 9.99999974E-6 : f32
      %296 = vector.broadcast %cst_102 : f32 to vector<1x1xf32>
      %297 = arith.addf %293, %296 : vector<1x1xf32>
      %298 = math.rsqrt %297 : vector<1x1xf32>
      %299 = vector.broadcast %298 : vector<1x1xf32> to vector<1x32xf32>
      %300 = arith.mulf %295, %299 : vector<1x32xf32>
      %301 = arith.mulf %300, %281 : vector<1x32xf32>
      %302 = arith.addf %301, %282 : vector<1x32xf32>
      %c0_103 = arith.constant 0 : index
      %c0_104 = arith.constant 0 : index
      %c0_105 = arith.constant 0 : index
      %303 = vector.load %arg20[%c0_103, %c0_104, %c0_105] : memref<2x1x32xf32, #tpu.memory_space<vmem>>, vector<1x1x32xf32>
      %304 = vector.shape_cast %303 : vector<1x1x32xf32> to vector<1x32xf32>
      %305 = vector.shape_cast %302 : vector<1x32xf32> to vector<1x1x32xf32>
      tpu.vector_store %arg20[%c0_103, %c0_104, %c0_105], %305 {strides = array<i32>} : memref<2x1x32xf32, #tpu.memory_space<vmem>>, vector<1x1x32xf32>,
    } else {
    }
    %c1 = arith.constant 1 : index
    %c0_63 = arith.constant 0 : index
    %c0_64 = arith.constant 0 : index
    %152 = vector.load %arg21[%c1, %c0_63, %c0_64] : memref<2x5x32xf32, #tpu.memory_space<vmem>>, vector<1x5x32xf32>
    %153 = vector.shape_cast %152 : vector<1x5x32xf32> to vector<5x32xf32>
    %cst_65 = arith.constant dense<0.000000e+00> : vector<5xf32>
    %154 = vector.multi_reduction <add>, %153, %cst_65 [1] : vector<5x32xf32> to vector<5xf32>
    %155 = vector.shape_cast %154 : vector<5xf32> to vector<5x1xf32>
    %cst_66 = arith.constant 3.200000e+01 : f32
    %156 = vector.broadcast %cst_66 : f32 to vector<5x1xf32>
    %157 = arith.divf %155, %156 : vector<5x1xf32>
    %158 = vector.broadcast %157 : vector<5x1xf32> to vector<5x32xf32>
    %159 = arith.subf %153, %158 : vector<5x32xf32>
    %160 = arith.mulf %159, %159 : vector<5x32xf32>
    %cst_67 = arith.constant dense<0.000000e+00> : vector<5xf32>
    %161 = vector.multi_reduction <add>, %160, %cst_67 [1] : vector<5x32xf32> to vector<5xf32>
    %162 = vector.shape_cast %161 : vector<5xf32> to vector<5x1xf32>
    %cst_68 = arith.constant 3.200000e+01 : f32
    %163 = vector.broadcast %cst_68 : f32 to vector<5x1xf32>
    %164 = arith.divf %162, %163 : vector<5x1xf32>
    %165 = vector.broadcast %157 : vector<5x1xf32> to vector<5x32xf32>
    %166 = arith.subf %153, %165 : vector<5x32xf32>
    %cst_69 = arith.constant 9.99999974E-6 : f32
    %167 = vector.broadcast %cst_69 : f32 to vector<5x1xf32>
    %168 = arith.addf %164, %167 : vector<5x1xf32>
    %169 = math.rsqrt %168 : vector<5x1xf32>
    %170 = vector.broadcast %169 : vector<5x1xf32> to vector<5x32xf32>
    %171 = arith.mulf %166, %170 : vector<5x32xf32>
    %172 = vector.broadcast %4 : vector<1x32xf32> to vector<5x32xf32>
    %173 = arith.mulf %171, %172 : vector<5x32xf32>
    %174 = vector.broadcast %6 : vector<1x32xf32> to vector<5x32xf32>
    %175 = arith.addf %173, %174 : vector<5x32xf32>
    %cst_70 = arith.constant dense<0.000000e+00> : vector<5x96xf32>
    %176 = tpu.matmul %175, %8, %cst_70 {dimension_numbers = #tpu.dot_dimension_numbers<[1], [0], [0], [1], [0, 0, 1, 1], [], []>} : vector<5x32xf32>, vector<32x96xf32>, vector<5x96xf32> -> vector<5x96xf32>
    %177 = vector.broadcast %10 : vector<1x96xf32> to vector<5x96xf32>
    %178 = arith.addf %176, %177 : vector<5x96xf32>
    %179 = vector.extract_strided_slice %178 {offsets = [0, 0], sizes = [5, 32], strides = [1, 1]} : vector<5x96xf32> to vector<5x32xf32>
    %180 = vector.extract_strided_slice %178 {offsets = [0, 32], sizes = [5, 32], strides = [1, 1]} : vector<5x96xf32> to vector<5x32xf32>
    %181 = vector.extract_strided_slice %178 {offsets = [0, 64], sizes = [5, 32], strides = [1, 1]} : vector<5x96xf32> to vector<5x32xf32>
    %182 = vector.extract_strided_slice %179 {offsets = [0, 0], sizes = [5, 8], strides = [1, 1]} : vector<5x32xf32> to vector<5x8xf32>
    %183 = vector.extract_strided_slice %179 {offsets = [0, 8], sizes = [5, 8], strides = [1, 1]} : vector<5x32xf32> to vector<5x8xf32>
    %184 = vector.extract_strided_slice %179 {offsets = [0, 16], sizes = [5, 8], strides = [1, 1]} : vector<5x32xf32> to vector<5x8xf32>
    %185 = vector.extract_strided_slice %179 {offsets = [0, 24], sizes = [5, 8], strides = [1, 1]} : vector<5x32xf32> to vector<5x8xf32>
    %186 = vector.shape_cast %182 : vector<5x8xf32> to vector<1x5x8xf32>
    %187 = vector.shape_cast %183 : vector<5x8xf32> to vector<1x5x8xf32>
    %188 = vector.shape_cast %184 : vector<5x8xf32> to vector<1x5x8xf32>
    %189 = vector.shape_cast %185 : vector<5x8xf32> to vector<1x5x8xf32>
    %190 = tpu.concatenate %186, %187, %188, %189 in 0 : vector<1x5x8xf32>, vector<1x5x8xf32>, vector<1x5x8xf32>, vector<1x5x8xf32> -> vector<4x5x8xf32>
    %191 = vector.extract_strided_slice %180 {offsets = [0, 0], sizes = [5, 8], strides = [1, 1]} : vector<5x32xf32> to vector<5x8xf32>
    %192 = vector.extract_strided_slice %180 {offsets = [0, 8], sizes = [5, 8], strides = [1, 1]} : vector<5x32xf32> to vector<5x8xf32>
    %193 = vector.extract_strided_slice %180 {offsets = [0, 16], sizes = [5, 8], strides = [1, 1]} : vector<5x32xf32> to vector<5x8xf32>
    %194 = vector.extract_strided_slice %180 {offsets = [0, 24], sizes = [5, 8], strides = [1, 1]} : vector<5x32xf32> to vector<5x8xf32>
    %195 = vector.shape_cast %191 : vector<5x8xf32> to vector<1x5x8xf32>
    %196 = vector.shape_cast %192 : vector<5x8xf32> to vector<1x5x8xf32>
    %197 = vector.shape_cast %193 : vector<5x8xf32> to vector<1x5x8xf32>
    %198 = vector.shape_cast %194 : vector<5x8xf32> to vector<1x5x8xf32>
    %199 = tpu.concatenate %195, %196, %197, %198 in 0 : vector<1x5x8xf32>, vector<1x5x8xf32>, vector<1x5x8xf32>, vector<1x5x8xf32> -> vector<4x5x8xf32>
    %200 = vector.extract_strided_slice %181 {offsets = [0, 0], sizes = [5, 8], strides = [1, 1]} : vector<5x32xf32> to vector<5x8xf32>
    %201 = vector.extract_strided_slice %181 {offsets = [0, 8], sizes = [5, 8], strides = [1, 1]} : vector<5x32xf32> to vector<5x8xf32>
    %202 = vector.extract_strided_slice %181 {offsets = [0, 16], sizes = [5, 8], strides = [1, 1]} : vector<5x32xf32> to vector<5x8xf32>
    %203 = vector.extract_strided_slice %181 {offsets = [0, 24], sizes = [5, 8], strides = [1, 1]} : vector<5x32xf32> to vector<5x8xf32>
    %204 = vector.shape_cast %200 : vector<5x8xf32> to vector<1x5x8xf32>
    %205 = vector.shape_cast %201 : vector<5x8xf32> to vector<1x5x8xf32>
    %206 = vector.shape_cast %202 : vector<5x8xf32> to vector<1x5x8xf32>
    %207 = vector.shape_cast %203 : vector<5x8xf32> to vector<1x5x8xf32>
    %208 = tpu.concatenate %204, %205, %206, %207 in 0 : vector<1x5x8xf32>, vector<1x5x8xf32>, vector<1x5x8xf32>, vector<1x5x8xf32> -> vector<4x5x8xf32>
    "tpu.trace_start"() <{level = 10 : i32, message = "hqd,hkd->hqk"}> : () -> ()
    %cst_71 = arith.constant dense<0.000000e+00> : vector<4x5x5xf32>
    %209 = tpu.matmul %190, %199, %cst_71 {dimension_numbers = #tpu.dot_dimension_numbers<[2], [2], [1], [1], [0, 0, 0, 1, 1, 1], [0], [0]>} : vector<4x5x8xf32>, vector<4x5x8xf32>, vector<4x5x5xf32> -> vector<4x5x5xf32>
    "tpu.trace_stop"() : () -> ()
    %cst_72 = arith.constant dense<0xFF800000> : vector<4x5xf32>
    %210 = vector.multi_reduction <maximumf>, %209, %cst_72 [2] : vector<4x5x5xf32> to vector<4x5xf32>
    %211 = vector.shape_cast %210 : vector<4x5xf32> to vector<4x5x1xf32>
    %212 = vector.broadcast %211 : vector<4x5x1xf32> to vector<4x5x5xf32>
    %213 = arith.subf %209, %212 : vector<4x5x5xf32>
    %214 = math.exp %213 : vector<4x5x5xf32>
    %cst_73 = arith.constant dense<0.000000e+00> : vector<4x5xf32>
    %215 = vector.multi_reduction <add>, %214, %cst_73 [2] : vector<4x5x5xf32> to vector<4x5xf32>
    %216 = vector.shape_cast %215 : vector<4x5xf32> to vector<4x5x1xf32>
    %217 = tpu.reciprocal %216 {approx = true} : vector<4x5x1xf32> -> vector<4x5x1xf32>
    %218 = vector.broadcast %217 : vector<4x5x1xf32> to vector<4x5x5xf32>
    %219 = arith.mulf %214, %218 : vector<4x5x5xf32>
    "tpu.trace_start"() <{level = 10 : i32, message = "hqk,hkd->hqd"}> : () -> ()
    %cst_74 = arith.constant dense<0.000000e+00> : vector<4x5x8xf32>
    %220 = tpu.matmul %219, %208, %cst_74 {dimension_numbers = #tpu.dot_dimension_numbers<[2], [1], [1], [2], [0, 0, 0, 1, 1, 2], [0], [0]>} : vector<4x5x5xf32>, vector<4x5x8xf32>, vector<4x5x8xf32> -> vector<4x5x8xf32>
    "tpu.trace_stop"() : () -> ()
    %221 = vector.extract_strided_slice %220 {offsets = [0, 0, 0], sizes = [1, 5, 8], strides = [1, 1, 1]} : vector<4x5x8xf32> to vector<1x5x8xf32>
    %222 = vector.shape_cast %221 : vector<1x5x8xf32> to vector<5x8xf32>
    %223 = vector.extract_strided_slice %220 {offsets = [1, 0, 0], sizes = [1, 5, 8], strides = [1, 1, 1]} : vector<4x5x8xf32> to vector<1x5x8xf32>
    %224 = vector.shape_cast %223 : vector<1x5x8xf32> to vector<5x8xf32>
    %225 = vector.extract_strided_slice %220 {offsets = [2, 0, 0], sizes = [1, 5, 8], strides = [1, 1, 1]} : vector<4x5x8xf32> to vector<1x5x8xf32>
    %226 = vector.shape_cast %225 : vector<1x5x8xf32> to vector<5x8xf32>
    %227 = vector.extract_strided_slice %220 {offsets = [3, 0, 0], sizes = [1, 5, 8], strides = [1, 1, 1]} : vector<4x5x8xf32> to vector<1x5x8xf32>
    %228 = vector.shape_cast %227 : vector<1x5x8xf32> to vector<5x8xf32>
    %229 = tpu.concatenate %222, %224, %226, %228 in 1 : vector<5x8xf32>, vector<5x8xf32>, vector<5x8xf32>, vector<5x8xf32> -> vector<5x32xf32>
    %cst_75 = arith.constant dense<0.000000e+00> : vector<5x32xf32>
    %230 = tpu.matmul %229, %12, %cst_75 {dimension_numbers = #tpu.dot_dimension_numbers<[1], [0], [0], [1], [0, 0, 1, 1], [], []>} : vector<5x32xf32>, vector<32x32xf32>, vector<5x32xf32> -> vector<5x32xf32>
    %231 = vector.broadcast %14 : vector<1x32xf32> to vector<5x32xf32>
    %232 = arith.addf %230, %231 : vector<5x32xf32>
    %233 = arith.addf %153, %232 : vector<5x32xf32>
    %cst_76 = arith.constant dense<0.000000e+00> : vector<5xf32>
    %234 = vector.multi_reduction <add>, %233, %cst_76 [1] : vector<5x32xf32> to vector<5xf32>
    %235 = vector.shape_cast %234 : vector<5xf32> to vector<5x1xf32>
    %cst_77 = arith.constant 3.200000e+01 : f32
    %236 = vector.broadcast %cst_77 : f32 to vector<5x1xf32>
    %237 = arith.divf %235, %236 : vector<5x1xf32>
    %238 = vector.broadcast %237 : vector<5x1xf32> to vector<5x32xf32>
    %239 = arith.subf %233, %238 : vector<5x32xf32>
    %240 = arith.mulf %239, %239 : vector<5x32xf32>
    %cst_78 = arith.constant dense<0.000000e+00> : vector<5xf32>
    %241 = vector.multi_reduction <add>, %240, %cst_78 [1] : vector<5x32xf32> to vector<5xf32>
    %242 = vector.shape_cast %241 : vector<5xf32> to vector<5x1xf32>
    %cst_79 = arith.constant 3.200000e+01 : f32
    %243 = vector.broadcast %cst_79 : f32 to vector<5x1xf32>
    %244 = arith.divf %242, %243 : vector<5x1xf32>
    %245 = vector.broadcast %237 : vector<5x1xf32> to vector<5x32xf32>
    %246 = arith.subf %233, %245 : vector<5x32xf32>
    %cst_80 = arith.constant 9.99999974E-6 : f32
    %247 = vector.broadcast %cst_80 : f32 to vector<5x1xf32>
    %248 = arith.addf %244, %247 : vector<5x1xf32>
    %249 = math.rsqrt %248 : vector<5x1xf32>
    %250 = vector.broadcast %249 : vector<5x1xf32> to vector<5x32xf32>
    %251 = arith.mulf %246, %250 : vector<5x32xf32>
    %252 = vector.broadcast %16 : vector<1x32xf32> to vector<5x32xf32>
    %253 = arith.mulf %251, %252 : vector<5x32xf32>
    %254 = vector.broadcast %18 : vector<1x32xf32> to vector<5x32xf32>
    %255 = arith.addf %253, %254 : vector<5x32xf32>
    %cst_81 = arith.constant dense<0.000000e+00> : vector<5x64xf32>
    %256 = tpu.matmul %255, %20, %cst_81 {dimension_numbers = #tpu.dot_dimension_numbers<[1], [0], [0], [1], [0, 0, 1, 1], [], []>} : vector<5x32xf32>, vector<32x64xf32>, vector<5x64xf32> -> vector<5x64xf32>
    %257 = vector.broadcast %22 : vector<1x64xf32> to vector<5x64xf32>
    %258 = arith.addf %256, %257 : vector<5x64xf32>
    %cst_82 = arith.constant 5.000000e-01 : f32
    %259 = vector.broadcast %cst_82 : f32 to vector<5x64xf32>
    %260 = arith.mulf %259, %258 : vector<5x64xf32>
    %cst_83 = arith.constant 0.707106769 : f32
    %261 = vector.broadcast %cst_83 : f32 to vector<5x64xf32>
    %262 = arith.mulf %258, %261 : vector<5x64xf32>
    %263 = math.erf %262 : vector<5x64xf32>
    %cst_84 = arith.constant 1.000000e+00 : f32
    %264 = vector.broadcast %cst_84 : f32 to vector<5x64xf32>
    %265 = arith.addf %264, %263 : vector<5x64xf32>
    %266 = arith.mulf %260, %265 : vector<5x64xf32>
    %cst_85 = arith.constant dense<0.000000e+00> : vector<5x32xf32>
    %267 = tpu.matmul %266, %24, %cst_85 {dimension_numbers = #tpu.dot_dimension_numbers<[1], [0], [0], [1], [0, 0, 1, 1], [], []>} : vector<5x64xf32>, vector<64x32xf32>, vector<5x32xf32> -> vector<5x32xf32>
    %268 = arith.addf %233, %267 : vector<5x32xf32>
    %269 = vector.broadcast %26 : vector<1x32xf32> to vector<5x32xf32>
    %270 = arith.addf %268, %269 : vector<5x32xf32>
    %c1_86 = arith.constant 1 : index
    %c0_87 = arith.constant 0 : index
    %c0_88 = arith.constant 0 : index
    %271 = vector.load %arg21[%c1_86, %c0_87, %c0_88] : memref<2x5x32xf32, #tpu.memory_space<vmem>>, vector<1x5x32xf32>
    %272 = vector.shape_cast %271 : vector<1x5x32xf32> to vector<5x32xf32>
    %273 = vector.shape_cast %270 : vector<5x32xf32> to vector<1x5x32xf32>
    tpu.vector_store %arg21[%c1_86, %c0_87, %c0_88], %273 {strides = array<i32>} : memref<2x5x32xf32, #tpu.memory_space<vmem>>, vector<1x5x32xf32>,
    %c1_i32_89 = arith.constant 1 : i32
    %274 = arith.cmpi eq, %arg0, %c1_i32_89 : i32
    %275 = arith.extui %274 : i1 to i32
    %c0_i32_90 = arith.constant 0 : i32
    %276 = arith.cmpi ne, %275, %c0_i32_90 : i32
    scf.if %276 {
      %c1_91 = arith.constant 1 : index
      %c0_92 = arith.constant 0 : index
      %c0_93 = arith.constant 0 : index
      %277 = vector.load %arg19[%c1_91, %c0_92, %c0_93] : memref<2x5x32xf32, #tpu.memory_space<vmem>>, vector<1x5x32xf32>
      %278 = vector.shape_cast %277 : vector<1x5x32xf32> to vector<5x32xf32>
      %279 = vector.shape_cast %270 : vector<5x32xf32> to vector<1x5x32xf32>
      tpu.vector_store %arg19[%c1_91, %c0_92, %c0_93], %279 {strides = array<i32>} : memref<2x5x32xf32, #tpu.memory_space<vmem>>, vector<1x5x32xf32>,
      %280 = vector.extract_strided_slice %270 {offsets = [0, 0], sizes = [1, 32], strides = [1, 1]} : vector<5x32xf32> to vector<1x32xf32>
      %c0_94 = arith.constant 0 : index
      %c0_95 = arith.constant 0 : index
      %281 = vector.load %arg17[%c0_94, %c0_95] : memref<1x32xf32, #tpu.memory_space<vmem>>, vector<1x32xf32>
      %c0_96 = arith.constant 0 : index
      %c0_97 = arith.constant 0 : index
      %282 = vector.load %arg18[%c0_96, %c0_97] : memref<1x32xf32, #tpu.memory_space<vmem>>, vector<1x32xf32>
      %cst_98 = arith.constant dense<0.000000e+00> : vector<1xf32>
      %283 = vector.multi_reduction <add>, %280, %cst_98 [1] : vector<1x32xf32> to vector<1xf32>
      %284 = vector.shape_cast %283 : vector<1xf32> to vector<1x1xf32>
      %cst_99 = arith.constant 3.200000e+01 : f32
      %285 = vector.broadcast %cst_99 : f32 to vector<1x1xf32>
      %286 = arith.divf %284, %285 : vector<1x1xf32>
      %287 = vector.broadcast %286 : vector<1x1xf32> to vector<1x32xf32>
      %288 = arith.subf %280, %287 : vector<1x32xf32>
      %289 = arith.mulf %288, %288 : vector<1x32xf32>
      %cst_100 = arith.constant dense<0.000000e+00> : vector<1xf32>
      %290 = vector.multi_reduction <add>, %289, %cst_100 [1] : vector<1x32xf32> to vector<1xf32>
      %291 = vector.shape_cast %290 : vector<1xf32> to vector<1x1xf32>
      %cst_101 = arith.constant 3.200000e+01 : f32
      %292 = vector.broadcast %cst_101 : f32 to vector<1x1xf32>
      %293 = arith.divf %291, %292 : vector<1x1xf32>
      %294 = vector.broadcast %286 : vector<1x1xf32> to vector<1x32xf32>
      %295 = arith.subf %280, %294 : vector<1x32xf32>
      %cst_102 = arith.constant 9.99999974E-6 : f32
      %296 = vector.broadcast %cst_102 : f32 to vector<1x1xf32>
      %297 = arith.addf %293, %296 : vector<1x1xf32>
      %298 = math.rsqrt %297 : vector<1x1xf32>
      %299 = vector.broadcast %298 : vector<1x1xf32> to vector<1x32xf32>
      %300 = arith.mulf %295, %299 : vector<1x32xf32>
      %301 = arith.mulf %300, %281 : vector<1x32xf32>
      %302 = arith.addf %301, %282 : vector<1x32xf32>
      %c1_103 = arith.constant 1 : index
      %c0_104 = arith.constant 0 : index
      %c0_105 = arith.constant 0 : index
      %303 = vector.load %arg20[%c1_103, %c0_104, %c0_105] : memref<2x1x32xf32, #tpu.memory_space<vmem>>, vector<1x1x32xf32>
      %304 = vector.shape_cast %303 : vector<1x1x32xf32> to vector<1x32xf32>
      %305 = vector.shape_cast %302 : vector<1x32xf32> to vector<1x1x32xf32>
      tpu.vector_store %arg20[%c1_103, %c0_104, %c0_105], %305 {strides = array<i32>} : memref<2x1x32xf32, #tpu.memory_space<vmem>>, vector<1x1x32xf32>,
    } else {
    }
    return
  }
  func.func @transform_0(%arg0: i32) -> (i32, i32, i32) {
    %c0_i32 = arith.constant 0 : i32
    %c0_i32_0 = arith.constant 0 : i32
    %c0_i32_1 = arith.constant 0 : i32
    %c0_i32_2 = arith.constant 0 : i32
    return %c0_i32, %c0_i32_0, %c0_i32_1 : i32, i32, i32
  }
  func.func @transform_1(%arg0: i32) -> (i32, i32) {
    %c0_i32 = arith.constant 0 : i32
    %c0_i32_0 = arith.constant 0 : i32
    %c0_i32_1 = arith.constant 0 : i32
    return %c0_i32, %c0_i32_0 : i32, i32
  }
  func.func @transform_2(%arg0: i32) -> (i32, i32) {
    %c0_i32 = arith.constant 0 : i32
    %c0_i32_0 = arith.constant 0 : i32
    %c0_i32_1 = arith.constant 0 : i32
    return %c0_i32, %c0_i32_0 : i32, i32
  }
  func.func @transform_3(%arg0: i32) -> (i32, i32) {
    %c0_i32 = arith.constant 0 : i32
    %c0_i32_0 = arith.constant 0 : i32
    %c0_i32_1 = arith.constant 0 : i32
    return %c0_i32, %c0_i32_0 : i32, i32
  }
  func.func @transform_4(%arg0: i32) -> (i32, i32, i32) {
    %c0_i32 = arith.constant 0 : i32
    %c0_i32_0 = arith.constant 0 : i32
    %c0_i32_1 = arith.constant 0 : i32
    return %arg0, %c0_i32, %c0_i32_0 : i32, i32, i32
  }
  func.func @transform_5(%arg0: i32) -> (i32, i32, i32) {
    %c0_i32 = arith.constant 0 : i32
    %c0_i32_0 = arith.constant 0 : i32
    %c0_i32_1 = arith.constant 0 : i32
    return %arg0, %c0_i32, %c0_i32_0 : i32, i32, i32
  }
  func.func @transform_6(%arg0: i32) -> (i32, i32, i32) {
    %c0_i32 = arith.constant 0 : i32
    %c0_i32_0 = arith.constant 0 : i32
    %c0_i32_1 = arith.constant 0 : i32
    return %arg0, %c0_i32, %c0_i32_0 : i32, i32, i32
  }
  func.func @transform_7(%arg0: i32) -> (i32, i32, i32) {
    %c0_i32 = arith.constant 0 : i32
    %c0_i32_0 = arith.constant 0 : i32
    %c0_i32_1 = arith.constant 0 : i32
    return %arg0, %c0_i32, %c0_i32_0 : i32, i32, i32
  }
  func.func @transform_8(%arg0: i32) -> (i32, i32, i32) {
    %c0_i32 = arith.constant 0 : i32
    %c0_i32_0 = arith.constant 0 : i32
    %c0_i32_1 = arith.constant 0 : i32
    return %arg0, %c0_i32, %c0_i32_0 : i32, i32, i32
  }
  func.func @transform_9(%arg0: i32) -> (i32, i32, i32) {
    %c0_i32 = arith.constant 0 : i32
    %c0_i32_0 = arith.constant 0 : i32
    %c0_i32_1 = arith.constant 0 : i32
    return %arg0, %c0_i32, %c0_i32_0 : i32, i32, i32
  }
  func.func @transform_10(%arg0: i32) -> (i32, i32, i32) {
    %c0_i32 = arith.constant 0 : i32
    %c0_i32_0 = arith.constant 0 : i32
    %c0_i32_1 = arith.constant 0 : i32
    return %arg0, %c0_i32, %c0_i32_0 : i32, i32, i32
  }
  func.func @transform_11(%arg0: i32) -> (i32, i32, i32) {
    %c0_i32 = arith.constant 0 : i32
    %c0_i32_0 = arith.constant 0 : i32
    %c0_i32_1 = arith.constant 0 : i32
    return %arg0, %c0_i32, %c0_i32_0 : i32, i32, i32
  }
  func.func @transform_12(%arg0: i32) -> (i32, i32, i32) {
    %c0_i32 = arith.constant 0 : i32
    %c0_i32_0 = arith.constant 0 : i32
    %c0_i32_1 = arith.constant 0 : i32
    return %arg0, %c0_i32, %c0_i32_0 : i32, i32, i32
  }
  func.func @transform_13(%arg0: i32) -> (i32, i32, i32) {
    %c0_i32 = arith.constant 0 : i32
    %c0_i32_0 = arith.constant 0 : i32
    %c0_i32_1 = arith.constant 0 : i32
    return %arg0, %c0_i32, %c0_i32_0 : i32, i32, i32
  }
  func.func @transform_14(%arg0: i32) -> (i32, i32, i32) {
    %c0_i32 = arith.constant 0 : i32
    %c0_i32_0 = arith.constant 0 : i32
    %c0_i32_1 = arith.constant 0 : i32
    return %arg0, %c0_i32, %c0_i32_0 : i32, i32, i32
  }
  func.func @transform_15(%arg0: i32) -> (i32, i32, i32) {
    %c0_i32 = arith.constant 0 : i32
    %c0_i32_0 = arith.constant 0 : i32
    %c0_i32_1 = arith.constant 0 : i32
    return %arg0, %c0_i32, %c0_i32_0 : i32, i32, i32
  }
  func.func @transform_16(%arg0: i32) -> (i32, i32) {
    %c0_i32 = arith.constant 0 : i32
    %c0_i32_0 = arith.constant 0 : i32
    %c0_i32_1 = arith.constant 0 : i32
    return %c0_i32, %c0_i32_0 : i32, i32
  }
  func.func @transform_17(%arg0: i32) -> (i32, i32) {
    %c0_i32 = arith.constant 0 : i32
    %c0_i32_0 = arith.constant 0 : i32
    %c0_i32_1 = arith.constant 0 : i32
    return %c0_i32, %c0_i32_0 : i32, i32
  }
  func.func @transform_18(%arg0: i32) -> (i32, i32, i32) {
    %c0_i32 = arith.constant 0 : i32
    %c0_i32_0 = arith.constant 0 : i32
    %c0_i32_1 = arith.constant 0 : i32
    %c0_i32_2 = arith.constant 0 : i32
    return %c0_i32, %c0_i32_0, %c0_i32_1 : i32, i32, i32
  }
  func.func @transform_19(%arg0: i32) -> (i32, i32, i32) {
    %c0_i32 = arith.constant 0 : i32
    %c0_i32_0 = arith.constant 0 : i32
    %c0_i32_1 = arith.constant 0 : i32
    %c0_i32_2 = arith.constant 0 : i32
    return %c0_i32, %c0_i32_0, %c0_i32_1 : i32, i32, i32
  }
}

</mosaic_0001>

<bundles_post_ra>
// kernel: clip_vision_transformer.1
= control target key start
LH: loop header
LB: loop body
LE: loop exit
PB: predicated region body
PF: predicated region fallthrough
CT: control target
= control target key end

     0   :  { %s4613_s0 = inlined_call_operand.vmem [shape: f32[2,4,192], index: 0, kind: input, shape index: {}]   ;;  %s4614_s1 = inlined_call_operand.vmem [shape: f32[192,32], index: 1, kind: input, shape index: {}]   ;;  %s4615_s2 = inlined_call_operand.vmem [shape: f32[1,32], index: 2, kind: input, shape index: {}]   ;;  %s4616_s3 = inlined_call_operand.vmem [shape: f32[5,32], index: 3, kind: input, shape index: {}]   ;;  %s4617_s4 = inlined_call_operand.vmem [shape: f32[2,1,32], index: 4, kind: input, shape index: {}]   ;;  %s4618_s5 = inlined_call_operand.vmem [shape: f32[2,1,32], index: 5, kind: input, shape index: {}]   ;;  %s4619_s6 = inlined_call_operand.vmem [shape: f32[2,32,96], index: 6, kind: input, shape index: {}]   ;;  %s4620_s7 = inlined_call_operand.vmem [shape: f32[2,1,96], index: 7, kind: input, shape index: {}]   ;;  %s4621_s8 = inlined_call_operand.vmem [shape: f32[2,32,32], index: 8, kind: input, shape index: {}]   ;;  %s4622_s9 = inlined_call_operand.vmem [shape: f32[2,1,32], index: 9, kind: input, shape index: {}]   ;;  %s4623_s10 = inlined_call_operand.vmem [shape: f32[2,1,32], index: 10, kind: input, shape index: {}]   ;;  %s4624_s11 = inlined_call_operand.vmem [shape: f32[2,1,32], index: 11, kind: input, shape index: {}]   ;;  %s4625_s12 = inlined_call_operand.vmem [shape: f32[2,32,64], index: 12, kind: input, shape index: {}]   ;;  %s4626_s13 = inlined_call_operand.vmem [shape: f32[2,1,64], index: 13, kind: input, shape index: {}]   ;;  %s4627_s14 = inlined_call_operand.vmem [shape: f32[2,64,32], index: 14, kind: input, shape index: {}]   ;;  %s4628_s15 = inlined_call_operand.vmem [shape: f32[2,1,32], index: 15, kind: input, shape index: {}]   ;;  %s4629_s16 = inlined_call_operand.vmem [shape: f32[1,32], index: 16, kind: input, shape index: {}]   ;;  %s4630_s17 = inlined_call_operand.vmem [shape: f32[1,32], index: 17, kind: input, shape index: {}]   ;;  %s4631_s18 = inlined_call_operand.vmem [shape: f32[2,5,32], index: 18, kind: output, shape index: {0}]   ;;  %s4632_s19 = inlined_call_operand.hbm [shape: f32[2,1,32], index: 19, kind: output, shape index: {1}]  }
   0x1   :  { %4639 = sst [smem:[#allocation7_spill]] %s4613_s0 }
   0x2   :  { %4640 = sst [smem:[#allocation8_spill]] %s4614_s1 }
   0x3   :  { %4641 = sst [smem:[#allocation9_spill]] %s4615_s2 }
   0x4   :  { %4642 = sst [smem:[#allocation10_spill]] %s4616_s3 }
   0x5   :  { %4643 = sst [smem:[#allocation11_spill]] %s4619_s6 }
   0x6   :  { %4644 = sst [smem:[#allocation12_spill]] %s4621_s8 }
   0x7   :  { %4645 = sst [smem:[#allocation13_spill]] %s4629_s16 }
   0x8   :  { %4646 = sst [smem:[#allocation14_spill]] %s4630_s17 }
   0x9   :  { %4647 = sst [smem:[#allocation15_spill]] %s4631_s18 }
   0xa   :  { %4648 = sst [smem:[#allocation16_spill]] %s4632_s19 }
   0xb   :  { %25 = vsyncpa [#allocation4], 0  ;;  %s3997_s0 = smov 0  }
   0xc LB: > { %4649 = sst [smem:[#allocation6_spill]] %s3881_s0  ;;  %s4003_s30 = sadd.s32 4294967295, %s3881_s0   ;;  %s3881_s0 = sphi %s3997_s0, %s31_s0  }
   0xd   : > { %p3299_p0 = scmp.ge.s32.totalorder %s3881_s0, 1  ;;  %p625_p1 = scmp.lt.s32.totalorder %s3881_s0, 3 }
   0xf   : > { %p626_p2 = pnand %p3299_p0, %p625_p1 }
  0x10   : > { %p715_p3 = scmp.lt.s32.totalorder (!%p626_p2), %s4003_s30, 1  ;;  %s4650_s6 = sld [smem:[#allocation11_spill]] (!%p626_p2) }
  0x11   : > { %629 = sbr.rel (%p626_p2) target bundleno = 6166 (0x1816), region = 92  ;;  %s4651_s8 = sld [smem:[#allocation12_spill]] (!%p626_p2) }
  0x12   : > { %p3308_p4 = scmp.ne.s32.totalorder (!%p626_p2), %s4003_s30, 0 }
  0x18   : > { %s4009_s20 = scalar_select %p715_p3, %s4003_s30, 1 }
  0x19   : > { %762 = sbr.rel (%p3308_p4) target bundleno = 302 (0x12e), region = 96  ;;  %s4652_s28 = sld [smem:[#allocation9_spill]] (!%p3308_p4)  ;;  %vm791_vm0 = vcmask (!%p3308_p4), 253952   ;;  %v3883_v3 = vmov (!%p3308_p4), 0.0|0.0   ;;  %vm796_vm1 = vcmask (!%p3308_p4), 523264   ;;  %vm869_vm2 = vcmask (!%p3308_p4), 257024  }
  0x1a   : > { %s3367_s25 = sshll.u32 %s4009_s20, 5  ;;  %s739_s16 = scalar_lea.vmem %s4623_s10, %s4009_s20  ;;  %3635 = vmatprep.subr.bf16.mxu0 (!%p3308_p4), %v3883_v3  ;;  %3671 = vmatprep.subr.bf16.mxu1 (!%p3308_p4), %v3883_v3 }
  0x1b   : > { %s4027_s21 = scalar_lea.vmem %s4650_s6, %s3367_s25  ;;  %s4032_s19 = scalar_lea.vmem %s4651_s8, %s3367_s25 }
  0x1c   : > { %s742_s27 = scalar_lea.vmem %s4624_s11, %s4009_s20  ;;  %s4049_s6 = scalar_lea.vmem %s4625_s12, %s3367_s25 }
  0x1d   : > { %s3370_s18 = sshll.u32 %s4009_s20, 6  ;;  %s4653_s1 = sld [smem:[#allocation10_spill]] (!%p3308_p4) }
  0x1e   : > { %s4059_s2 = scalar_lea.vmem %s4627_s14, %s3370_s18  ;;  %s4654_s25 = sld [smem:[#allocation8_spill]] (!%p3308_p4) }
  0x1f   : > { %v788_v0 = vld [vmem:[%s4652_s28] sm:$0x1] (!%p3308_p4)  ;;  %s4655_s29 = sld [smem:[#allocation7_spill]] (!%p3308_p4) }
  0x20   : > { %v897_v4 = vld [vmem:[%s4652_s28] sm:$0x1] }
  0x23   : > { %v789_v1 = vld [vmem:[%s4653_s1] sm:$0x1]  ;;  %v793_v47 = vld [vmem:[%s4653_s1 + $0x1] sm:$0xf] }
  0x24   : > { %v790_v2 = vadd.f32 %v789_v1, %v788_v0  ;;  %v898_v5 = vld [vmem:[%s4653_s1] sm:$0x1]  ;;  %v765_v8 = vld [vmem:[%s4654_s25 + $0x8] sm:$0xff]  ;;  %v766_v9 = vld [vmem:[%s4654_s25 + $0x10] sm:$0xff] }
  0x25   : > { %v764_v6 = vld [vmem:[%s4654_s25] sm:$0xff]  ;;  %v899_v7 = vadd.f32 %v898_v5, %v897_v4  ;;  %v767_v10 = vld [vmem:[%s4654_s25 + $0x18] sm:$0xff]  ;;  %v769_v14 = vld [vmem:[%s4654_s25 + $0x28] sm:$0xff] }
  0x26   : > { %792 = vst.msk [vmem:[#allocation2] sm:$0x1] %vm791_vm0, %v790_v2  ;;  %v3636_v11 = vpack.c.bf16 %v765_v8, %v764_v6  ;;  %v3639_v12 = vpack.c.bf16 %v767_v10, %v766_v9  ;;  %v768_v13 = vld [vmem:[%s4654_s25 + $0x20] sm:$0xff]  ;;  %v770_v17 = vld [vmem:[%s4654_s25 + $0x30] sm:$0xff]  ;;  %v771_v18 = vld [vmem:[%s4654_s25 + $0x38] sm:$0xff] }
  0x27   : > { %901 = vst.msk [vmem:[#allocation2 + $0x8] sm:$0x1] %vm791_vm0, %v899_v7  ;;  %v3642_v15 = vpack.c.bf16 %v769_v14, %v768_v13  ;;  %v4103_v16 = vld [vmem:[%s4655_s29] sm:$0xff]  ;;  %v4118_v20 = vld [vmem:[%s4655_s29 + $0x8] sm:$0xff]  ;;  %v3645_v22 = vpack.c.bf16 %v771_v18, %v770_v17  ;;  %v774_v26 = vld [vmem:[%s4654_s25 + $0x50] sm:$0xff] }
  0x28   : > { %3637 = vmatpush1.bf16.msra.mxu0 %v3636_v11  ;;  %3673 = vmatpush1.bf16.msra.mxu1 %v3636_v11  ;;  %v795_v19 = vcombine.high %v4103_v16, %v4103_v16  ;;  %v904_v21 = vcombine.high %v4118_v20, %v4118_v20  ;;  %v772_v23 = vld [vmem:[%s4654_s25 + $0x40] sm:$0xff]  ;;  %v773_v24 = vld [vmem:[%s4654_s25 + $0x48] sm:$0xff]  ;;  %v775_v27 = vld [vmem:[%s4654_s25 + $0x58] sm:$0xff] }
  0x29   : > { %3638 = vmatprep.subr.bf16.mxu0 %v3883_v3  ;;  %3674 = vmatprep.subr.bf16.mxu1 %v3883_v3  ;;  %v3648_v25 = vpack.c.bf16 %v773_v24, %v772_v23  ;;  %v3651_v28 = vpack.c.bf16 %v775_v27, %v774_v26  ;;  %v776_v29 = vld [vmem:[%s4654_s25 + $0x60] sm:$0xff]  ;;  %v777_v30 = vld [vmem:[%s4654_s25 + $0x68] sm:$0xff]  ;;  %v778_v32 = vld [vmem:[%s4654_s25 + $0x70] sm:$0xff] }
  0x2a   : > { %3309 = vmatprep.mubr.msk.f32.mxu0 %vm796_vm1, %v795_v19  ;;  %3311 = vmatprep.mubr.msk.f32.mxu1 %vm796_vm1, %v904_v21  ;;  %v3654_v31 = vpack.c.bf16 %v777_v30, %v776_v29  ;;  %v779_v33 = vld [vmem:[%s4654_s25 + $0x78] sm:$0xff]  ;;  %v780_v35 = vld [vmem:[%s4654_s25 + $0x80] sm:$0xff]  ;;  %v781_v36 = vld [vmem:[%s4654_s25 + $0x88] sm:$0xff] }
  0x2b   : > { %v3657_v34 = vpack.c.bf16 %v779_v33, %v778_v32  ;;  %v3660_v37 = vpack.c.bf16 %v781_v36, %v780_v35  ;;  %v782_v38 = vld [vmem:[%s4654_s25 + $0x90] sm:$0xff]  ;;  %v783_v39 = vld [vmem:[%s4654_s25 + $0x98] sm:$0xff]  ;;  %v784_v41 = vld [vmem:[%s4654_s25 + $0xa0] sm:$0xff] }
  0x2c   : > { %3640 = vmatpush1.bf16.msra.mxu0 %v3639_v12  ;;  %3676 = vmatpush1.bf16.msra.mxu1 %v3639_v12  ;;  %v3663_v40 = vpack.c.bf16 %v783_v39, %v782_v38  ;;  %v785_v42 = vld [vmem:[%s4654_s25 + $0xa8] sm:$0xff]  ;;  %v786_v44 = vld [vmem:[%s4654_s25 + $0xb0] sm:$0xff]  ;;  %v787_v45 = vld [vmem:[%s4654_s25 + $0xb8] sm:$0xff] }
  0x2d   : > { %3641 = vmatprep.subr.bf16.mxu0 %v3883_v3  ;;  %3677 = vmatprep.subr.bf16.mxu1 %v3883_v3  ;;  %v3666_v43 = vpack.c.bf16 %v785_v42, %v784_v41  ;;  %v3669_v46 = vpack.c.bf16 %v787_v45, %v786_v44  ;;  %v902_v48 = vld [vmem:[%s4653_s1 + $0x1] sm:$0xf] }
  0x30   : > { %3643 = vmatpush1.bf16.msra.mxu0 %v3642_v15  ;;  %3679 = vmatpush1.bf16.msra.mxu1 %v3642_v15 }
  0x31   : > { %3644 = vmatprep.subr.bf16.mxu0 %v3883_v3  ;;  %3680 = vmatprep.subr.bf16.mxu1 %v3883_v3 }
  0x34   : > { %3646 = vmatpush1.bf16.msra.mxu0 %v3645_v22  ;;  %3682 = vmatpush1.bf16.msra.mxu1 %v3645_v22 }
  0x35   : > { %3647 = vmatprep.subr.bf16.mxu0 %v3883_v3  ;;  %3683 = vmatprep.subr.bf16.mxu1 %v3883_v3 }
  0x38   : > { %3649 = vmatpush1.bf16.msra.mxu0 %v3648_v25  ;;  %3685 = vmatpush1.bf16.msra.mxu1 %v3648_v25 }
  0x39   : > { %3650 = vmatprep.subr.bf16.mxu0 %v3883_v3  ;;  %3686 = vmatprep.subr.bf16.mxu1 %v3883_v3 }
  0x3c   : > { %3652 = vmatpush1.bf16.msra.mxu0 %v3651_v28  ;;  %3688 = vmatpush1.bf16.msra.mxu1 %v3651_v28 }
  0x3d   : > { %3653 = vmatprep.subr.bf16.mxu0 %v3883_v3  ;;  %3689 = vmatprep.subr.bf16.mxu1 %v3883_v3 }
  0x40   : > { %3655 = vmatpush1.bf16.msra.mxu0 %v3654_v31  ;;  %3691 = vmatpush1.bf16.msra.mxu1 %v3654_v31 }
  0x41   : > { %3656 = vmatprep.subr.bf16.mxu0 %v3883_v3  ;;  %3692 = vmatprep.subr.bf16.mxu1 %v3883_v3 }
  0x44   : > { %3658 = vmatpush1.bf16.msra.mxu0 %v3657_v34  ;;  %3694 = vmatpush1.bf16.msra.mxu1 %v3657_v34 }
  0x45   : > { %3659 = vmatprep.subr.bf16.mxu0 %v3883_v3  ;;  %3695 = vmatprep.subr.bf16.mxu1 %v3883_v3 }
  0x48   : > { %3661 = vmatpush1.bf16.msra.mxu0 %v3660_v37  ;;  %3697 = vmatpush1.bf16.msra.mxu1 %v3660_v37 }
  0x49   : > { %3662 = vmatprep.subr.bf16.mxu0 %v3883_v3  ;;  %3698 = vmatprep.subr.bf16.mxu1 %v3883_v3 }
  0x4c   : > { %3664 = vmatpush1.bf16.msra.mxu0 %v3663_v40  ;;  %3700 = vmatpush1.bf16.msra.mxu1 %v3663_v40 }
  0x4d   : > { %3665 = vmatprep.subr.bf16.mxu0 %v3883_v3  ;;  %3701 = vmatprep.subr.bf16.mxu1 %v3883_v3 }
  0x50   : > { %3667 = vmatpush1.bf16.msra.mxu0 %v3666_v43  ;;  %3703 = vmatpush1.bf16.msra.mxu1 %v3666_v43 }
  0x51   : > { %3668 = vmatprep.subr.bf16.mxu0 %v3883_v3  ;;  %3704 = vmatprep.subr.bf16.mxu1 %v3883_v3 }
  0x54   : > { %3670 = vmatpush1.bf16.msra.mxu0 %v3669_v46  ;;  %3706 = vmatpush1.bf16.msra.mxu1 %v3669_v46 }
  0x57   : > { %864 = vmatmul.mubr.f32.vlgmr.msra.gmra.mrb[0].mxu0 %v4103_v16  ;;  %972 = vmatmul.mubr.f32.vlgmr.msra.gmra.mrb[0].mxu1 %v4118_v20 }
 0x12a   : > { %v865_v49 = vpop.f32.mrb[0].mxu0  ;;  %v973_v50 = vpop.f32.mrb[0].mxu1 }
 0x12b   : > { %v866_v51 = vadd.f32 %v865_v49, %v793_v47  ;;  %v974_v52 = vadd.f32 %v973_v50, %v902_v48  ;;  %v867_v53 = vpop.f32.mrb[1].mxu0  ;;  %v975_v54 = vpop.f32.mrb[1].mxu1 }
 0x12d   : > { %870 = vst.msk [vmem:[#allocation2 + $0x1] sm:$0xf] %vm869_vm2, %v866_v51  ;;  %977 = vst.msk [vmem:[#allocation2 + $0x9] sm:$0xf] %vm869_vm2, %v974_v52 }
 0x12e PF: > { %vm1007_vm3 = vcmask 258048   ;;  %v980_v62 = vld [vmem:[%s4027_s21] sm:$0xff]  ;;  %v981_v63 = vld [vmem:[%s4027_s21 + $0x8] sm:$0xff]  ;;  %v982_v0 = vld [vmem:[%s4027_s21 + $0x10] sm:$0xff]  ;;  %v3884_v1 = vmov 0.0|0.0   ;;  %vm3885_vm4 = vmmov 0   ;;  %s4656_s23 = scalar_lea.vmem %s4617_s4, %s4009_s20  ;;  %s4657_s18 = scalar_lea.vmem %s4618_s5, %s4009_s20 }
 0x12f   : > { %3707 = vmatprep.subr.bf16.mxu1 %v3884_v1  ;;  %v4208_v2 = vpack.c.bf16 %v981_v63, %v980_v62  ;;  %v983_v3 = vld [vmem:[%s4027_s21 + $0x18] sm:$0xff]  ;;  %v3886_v4 = vmov 0.0   ;;  %v4227_v10 = vld [vmem:[%s4656_s23] ss:$0 sm:$0xff]  ;;  %vm1042_vm5 = vcmask 261120   ;;  %s4658_s24 = scalar_lea.vmem %s4620_s7, %s4009_s20  ;;  %s3887_s8 = smov 104  }
 0x130   : > { %3459 = vmatprep.mubr.msk.f32.mxu1 %vm3885_vm4, %v3886_v4  ;;  %3472 = vmatprep.subr.mxu0 %v3886_v4  ;;  %v4217_v5 = vpack.c.bf16 %v983_v3, %v982_v0  ;;  %v4234_v12 = vld [vmem:[%s4657_s18] ss:$0 sm:$0xff]  ;;  %s3888_s21 = smov 120   ;;  %s3889_s3 = smov 112   ;;  %vm1125_vm6 = vcmask 64512   ;;  %vm1428_vm7 = vcmask 36864  }
 0x131   : > { %3474 = vmatprep.mubr.msk.f32.mxu0 %vm3885_vm4, %v3886_v4  ;;  %3709 = vmatpush3.bf16.msra.mxu1 %v4208_v2  ;;  %v4246_v15 = vld [vmem:[%s4658_s24] ss:$0 sm:$0xff]  ;;  %s3890_s23 = smov 96   ;;  %s3891_s26 = smov 64   ;;  %vm1479_vm8 = vcmask 1044480   ;;  %vm1475_vm9 = vcmask 39936  }
 0x132   : > { %3710 = vmatprep.subr.bf16.mxu1 %v3884_v1  ;;  %s3892_s0 = smov 8   ;;  %s3893_s18 = smov 16   ;;  %vm1796_vm10 = vcmask 130048   ;;  %vm1798_vm11 = vcmask 195584   ;;  %vm1991_vm12 = vcmask 523264  }
 0x133   : > { %s3894_s17 = smov 24   ;;  %s4659_s24 = scalar_lea.vmem %s4622_s9, %s4009_s20 }
 0x134   : > { %v4198_v55 = vld [vmem:[#allocation2] sm:$0x1f]  ;;  %p3340_p5 = scmp.ne.s32.totalorder %s4003_s30, 1 }
 0x135   : > { %v1008_v56 = vsel %vm1007_vm3, %v4198_v55, 0.0  ;;  %3712 = vmatpush3.bf16.msra.mxu1 %v4217_v5  ;;  %vm2081_vm13 = vcmask (!%p3340_p5), 253952  }
 0x136   : > { %1009 = vadd.xlane.f32.xlu0 %v1008_v56  ;;  %3462 = vmatprep.subr.mxu1 %v3886_v4 }
 0x1c3   : > { %v1010_v57 = vpop.xlane.xlu0 %1009 }
 0x1c4   : > { %v1012_v58 = vmul.f32 0.03125, %v1010_v57 }
 0x1c6   : > { %v1013_v59 = vsub.f32 %v4198_v55, %v1012_v58 }
 0x1c8   : > { %v1014_v60 = vmul.f32 %v1013_v59, %v1013_v59 }
 0x1ca   : > { %v1015_v61 = vsel %vm1007_vm3, %v1014_v60, 0.0 }
 0x1cb   : > { %1016 = vadd.xlane.f32.xlu0 %v1015_v61 }
 0x258   : > { %v1017_v6 = vpop.xlane.xlu0 %1016 }
 0x259   : > { %v1018_v7 = vmul.f32 0.03125, %v1017_v6 }
 0x25b   : > { %v1019_v8 = vadd.f32 1e-05, %v1018_v7 }
 0x25d   : > { %3797 = vrsqrt.f32 %v1019_v8 }
 0x267   : > { %v3798_v9 = vpop.eup %3797 }
 0x268   : > { %v1021_v11 = vmul.f32 %v3798_v9, %v1013_v59 }
 0x26a   : > { %v1028_v13 = vmul.f32 %v4227_v10, %v1021_v11 }
 0x26c   : > { %v1035_v14 = vadd.f32 %v4234_v12, %v1028_v13 }
 0x26e   : > { %3460 = vmatmul.mubr.msk.f32.vlgmr.msra.gmra.mrb[0].mxu1 %vm1042_vm5, %v1035_v14 }
 0x26f   : > { %3464 = vmatprep.mubr.msk.f32.mxu1 %vm3885_vm4, %v3886_v4 }
 0x341   : > { %v1112_v16 = vpop.f32.mrb[0].mxu1 }
 0x342   : > { %v1113_v17 = vadd.f32 %v4246_v15, %v1112_v16  ;;  %v3461_v18 = vpop.f32.mrb[1].mxu1 }
 0x344   : > { %1121 = vrot.lane.b32.xlu0 %v1113_v17, %s3887_s8  ;;  %1117 = vrot.lane.b32.xlu1 %v1113_v17, %s3888_s21 }
 0x348   : > { %1119 = vrot.lane.b32.xlu1 %v1113_v17, %s3889_s3 }
 0x34c   : > { %1123 = vrot.lane.b32.xlu1 %v1113_v17, %s3890_s23 }
 0x3b6   : > { %v4253_v19 = vpop.permute.xlu1 %1117  ;;  %v4261_v21 = vpop.permute.xlu0 %1121 }
 0x3b7   : > { %1200 = vrot.lane.b32.xlu1 %v4253_v19, %s3890_s23 }
 0x3ba   : > { %v4257_v20 = vpop.permute.xlu1 %1119 }
 0x3bb   : > { %1276 = vrot.lane.b32.xlu1 %v4257_v20, %s3890_s23 }
 0x3be   : > { %v1124_v22 = vpop.permute.xlu1 %1123 }
 0x3bf   : > { %1352 = vrot.lane.b32.xlu1 %v4261_v21, %s3890_s23  ;;  %3463 = vmatpush3.xpose.msk.msra.mxu1 %vm1125_vm6, %v1124_v22 }
 0x3c0   : > { %3467 = vmatprep.subr.mxu1 %v3886_v4 }
 0x3c2   : > { %3465 = vmatmul.mubr.msk.f32.vlgmr.msra.gmra.mrb[2].mxu1 %vm1125_vm6, %v1113_v17 }
 0x3c3   : > { %3469 = vmatprep.mubr.msk.f32.mxu1 %vm3885_vm4, %v3886_v4 }
 0x429   : > { %v1201_v23 = vpop.permute.xlu1 %1200 }
 0x42a   : > { %3468 = vmatpush3.xpose.msk.msra.mxu1 %vm1125_vm6, %v1201_v23  ;;  %v987_v23 = vld [vmem:[%s4032_s19 + $0x10] sm:$0xff] }
 0x42b   : > { %3477 = vmatprep.subr.mxu1 %v3886_v4 }
 0x42d   : > { %3470 = vmatmul.mubr.msk.f32.vlgmr.msra.gmra.mrb[4].mxu1 %vm1125_vm6, %v4253_v19  ;;  %v1277_v24 = vpop.permute.xlu1 %1276 }
 0x42e   : > { %3473 = vmatpush3.xpose.msk.msra.mxu0 %vm1125_vm6, %v1277_v24  ;;  %3479 = vmatprep.mubr.msk.f32.mxu1 %vm3885_vm4, %v3886_v4  ;;  %v988_v24 = vld [vmem:[%s4032_s19 + $0x18] sm:$0xff] }
 0x42f   : > { %3482 = vmatprep.subr.mxu0 %v3886_v4 }
 0x431   : > { %3475 = vmatmul.mubr.msk.f32.vlgmr.msra.gmra.mrb[0].mxu0 %vm1125_vm6, %v4257_v20  ;;  %v1353_v25 = vpop.permute.xlu1 %1352 }
 0x432   : > { %3478 = vmatpush3.xpose.msk.msra.mxu1 %vm1125_vm6, %v1353_v25  ;;  %3484 = vmatprep.mubr.msk.f32.mxu0 %vm3885_vm4, %v3886_v4  ;;  %v4331_v25 = vpack.c.bf16 %v988_v24, %v987_v23 }
 0x433   : > { %3487 = vmatprep.subr.mxu1 %v3886_v4 }
 0x435   : > { %3480 = vmatmul.mubr.msk.f32.vlgmr.msra.gmra.mrb[6].mxu1 %vm1125_vm6, %v4261_v21 }
 0x436   : > { %3489 = vmatprep.mubr.msk.f32.mxu1 %vm3885_vm4, %v3886_v4 }
 0x495   : > { %v1196_v26 = vpop.f32.mrb[2].mxu1 }
 0x496   : > { %v3466_v27 = vpop.f32.mrb[3].mxu1  ;;  %v1429_v28 = vsel %vm1428_vm7, %v1196_v26, -inf }
 0x497   : > { %1430 = vmax.xlane.f32.xlu1 %v1429_v28 }
 0x500   : > { %v1272_v29 = vpop.f32.mrb[4].mxu1 }
 0x501   : > { %v3471_v30 = vpop.f32.mrb[5].mxu1  ;;  %v1432_v31 = vsel %vm1428_vm7, %v1272_v29, -inf }
 0x502   : > { %1433 = vmax.xlane.f32.xlu0 %v1432_v31 }
 0x504   : > { %v1348_v32 = vpop.f32.mrb[0].mxu0 }
 0x505   : > { %v3476_v33 = vpop.f32.mrb[1].mxu0  ;;  %v1435_v34 = vsel %vm1428_vm7, %v1348_v32, -inf }
 0x506   : > { %1436 = vmax.xlane.f32.xlu1 %v1435_v34 }
 0x508   : > { %v1424_v35 = vpop.f32.mrb[6].mxu1 }
 0x509   : > { %v3481_v36 = vpop.f32.mrb[7].mxu1  ;;  %v1438_v37 = vsel %vm1428_vm7, %v1424_v35, -inf }
 0x50a   : > { %1439 = vmax.xlane.f32.xlu0 %v1438_v37 }
 0x517   : > { %1473 = vrot.lane.b32.xlu1 %v1113_v17, %s3891_s26 }
 0x524   : > { %v1431_v38 = vpop.xlane.xlu1 %1430 }
 0x525   : > { %v1441_v39 = vsub.f32 %v1196_v26, %v1431_v38  ;;  %v4349_v38 = vld [vmem:[%s4659_s24] ss:$0 sm:$0xff]  ;;  %s4664_s24 = sld [smem:[#allocation14_spill]] (!%p3340_p5) }
 0x527   : > { %v1445_v40 = vmul.f32 1.442695, %v1441_v39 }
 0x529   : > { %3799 = vpow2.f32 %v1445_v40 }
 0x533   : > { %v3800_v41 = vpop.eup %3799 }
 0x534   : > { %v1453_v42 = vsel %vm1428_vm7, %v3800_v41, 0.0 }
 0x53b   : > { %1454 = vadd.xlane.f32.xlu1 %v1453_v42 }
 0x58f   : > { %v1434_v43 = vpop.xlane.xlu0 %1433 }
 0x590   : > { %v1442_v44 = vsub.f32 %v1272_v29, %v1434_v43 }
 0x592   : > { %v1447_v45 = vmul.f32 1.442695, %v1442_v44 }
 0x593   : > { %v1437_v46 = vpop.xlane.xlu1 %1436 }
 0x594   : > { %3801 = vpow2.f32 %v1447_v45  ;;  %v1443_v47 = vsub.f32 %v1348_v32, %v1437_v46 }
 0x596   : > { %v1449_v48 = vmul.f32 1.442695, %v1443_v47 }
 0x597   : > { %v1474_v49 = vpop.permute.xlu1 %1473  ;;  %v1440_v50 = vpop.xlane.xlu0 %1439 }
 0x598   : > { %3803 = vpow2.f32 %v1449_v48  ;;  %v1444_v51 = vsub.f32 %v1424_v35, %v1440_v50  ;;  %3483 = vmatpush3.msk.msra.mxu0 %vm1479_vm8, %v1474_v49  ;;  %v992_v49 = vld [vmem:[%s4049_s6] sm:$0xff]  ;;  %v993_v50 = vld [vmem:[%s4049_s6 + $0x8] sm:$0xff] }
 0x599   : > { %3492 = vmatprep.subr.mxu0 %v3886_v4 }
 0x59a   : > { %v1451_v52 = vmul.f32 1.442695, %v1444_v51  ;;  %v4357_v51 = vpack.c.bf16 %v993_v50, %v992_v49 }
 0x59c   : > { %3805 = vpow2.f32 %v1451_v52  ;;  %v995_v52 = vld [vmem:[%s4049_s6 + $0x18] sm:$0xff] }
 0x59e   : > { %v3802_v53 = vpop.eup %3801 }
 0x59f   : > { %v1456_v54 = vsel %vm1428_vm7, %v3802_v53, 0.0 }
 0x5a0   : > { %1457 = vadd.xlane.f32.xlu0 %v1456_v54 }
 0x5a2   : > { %v3804_v56 = vpop.eup %3803 }
 0x5a3   : > { %v1459_v57 = vsel %vm1428_vm7, %v3804_v56, 0.0 }
 0x5a4   : > { %1460 = vadd.xlane.f32.xlu1 %v1459_v57 }
 0x5a6   : > { %v3806_v58 = vpop.eup %3805 }
 0x5a7   : > { %v1462_v59 = vsel %vm1428_vm7, %v3806_v58, 0.0 }
 0x5a8   : > { %1463 = vadd.xlane.f32.xlu0 %v1462_v59  ;;  %v4371_v59 = vld [vmem:[%s739_s16] ss:$0 sm:$0xff] }
 0x5b5   : > { %1629 = vrot.lane.b32.xlu1 %v4257_v20, %s3891_s26  ;;  %v985_v20 = vld [vmem:[%s4032_s19] sm:$0xff] }
 0x5b9   : > { %1706 = vrot.lane.b32.xlu1 %v4261_v21, %s3891_s26  ;;  %v986_v21 = vld [vmem:[%s4032_s19 + $0x8] sm:$0xff]  ;;  %s4660_s19 = scalar_lea.vmem %s4626_s13, %s4009_s20 }
 0x5ba   : > { %v4325_v22 = vpack.c.bf16 %v986_v21, %v985_v20 }
 0x5be   : > { %1552 = vrot.lane.b32.xlu0 %v4253_v19, %s3891_s26 }
 0x5c8   : > { %v1455_v60 = vpop.xlane.xlu1 %1454 }
 0x5c9   : > { %3807 = vrcp.f32 %v1455_v60 }
 0x5d3   : > { %v3808_v61 = vpop.eup %3807 }
 0x5d4   : > { %v1469_v62 = vmul.f32 %v3808_v61, %v3800_v41  ;;  %v4378_v61 = vld [vmem:[%s742_s27] ss:$0 sm:$0xff]  ;;  %s4662_s27 = sld [smem:[#allocation15_spill]] (!%p3340_p5) }
 0x5d6   : > { %3485 = vmatmul.mubr.msk.f32.vlgmr.msra.gmra.mrb[2].mxu0 %vm1475_vm9, %v1469_v62 }
 0x5d7   : > { %3494 = vmatprep.mubr.msk.f32.mxu0 %vm3885_vm4, %v3886_v4 }
 0x62d   : > { %v1458_v63 = vpop.xlane.xlu0 %1457 }
 0x62e   : > { %3809 = vrcp.f32 %v1458_v63 }
 0x631   : > { %v1461_v0 = vpop.xlane.xlu1 %1460 }
 0x632   : > { %3811 = vrcp.f32 %v1461_v0  ;;  %v997_v0 = vld [vmem:[%s4059_s2] sm:$0xff] }
 0x635   : > { %v1630_v3 = vpop.permute.xlu1 %1629  ;;  %v1464_v6 = vpop.xlane.xlu0 %1463 }
 0x636   : > { %3813 = vrcp.f32 %v1464_v6  ;;  %3493 = vmatpush3.msk.msra.mxu0 %vm1479_vm8, %v1630_v3  ;;  %v998_v3 = vld [vmem:[%s4059_s2 + $0x8] sm:$0xff] }
 0x637   : > { %3713 = vmatprep.subr.bf16.mxu0 %v3884_v1  ;;  %v4385_v6 = vpack.c.bf16 %v998_v3, %v997_v0 }
 0x638   : > { %v3810_v7 = vpop.eup %3809 }
 0x639   : > { %v1470_v8 = vmul.f32 %v3810_v7, %v3802_v53  ;;  %v1553_v9 = vpop.permute.xlu0 %1552  ;;  %v1707_v11 = vpop.permute.xlu1 %1706  ;;  %v999_v7 = vld [vmem:[%s4059_s2 + $0x10] sm:$0xff] }
 0x63a   : > { %3488 = vmatpush3.msk.msra.mxu1 %vm1479_vm8, %v1553_v9 }
 0x63b   : > { %3490 = vmatmul.mubr.msk.f32.vlgmr.msra.gmra.mrb[8].mxu1 %vm1475_vm9, %v1470_v8  ;;  %3497 = vmatprep.subr.mxu1 %v3886_v4  ;;  %v1000_v8 = vld [vmem:[%s4059_s2 + $0x18] sm:$0xff] }
 0x63c   : > { %v3812_v13 = vpop.eup %3811  ;;  %3498 = vmatpush3.msk.msra.mxu1 %vm1479_vm8, %v1707_v11  ;;  %3499 = vmatprep.mubr.msk.f32.mxu1 %vm3885_vm4, %v3886_v4  ;;  %v4391_v9 = vpack.c.bf16 %v1000_v8, %v999_v7  ;;  %v1001_v11 = vld [vmem:[%s4059_s2 + $0x20] sm:$0xff] }
 0x63d   : > { %v1471_v14 = vmul.f32 %v3812_v13, %v3804_v56  ;;  %3719 = vmatprep.subr.bf16.mxu1 %v3884_v1  ;;  %v1002_v13 = vld [vmem:[%s4059_s2 + $0x28] sm:$0xff] }
 0x63f   : > { %3495 = vmatmul.mubr.msk.f32.vlgmr.msra.gmra.mrb[4].mxu0 %vm1475_vm9, %v1471_v14  ;;  %v4397_v14 = vpack.c.bf16 %v1002_v13, %v1001_v11 }
 0x640   : > { %v3814_v16 = vpop.eup %3813  ;;  %3510 = vmatprep.mubr.msk.f32.mxu0 %vm3885_vm4, %v3886_v4  ;;  %3715 = vmatpush3.bf16.msra.mxu0 %v4325_v22 }
 0x641   : > { %v1472_v17 = vmul.f32 %v3814_v16, %v3806_v58  ;;  %3716 = vmatprep.subr.bf16.mxu0 %v3884_v1  ;;  %v1003_v16 = vld [vmem:[%s4059_s2 + $0x30] sm:$0xff] }
 0x643   : > { %3500 = vmatmul.mubr.msk.f32.vlgmr.msra.gmra.mrb[10].mxu1 %vm1475_vm9, %v1472_v17  ;;  %v1004_v17 = vld [vmem:[%s4059_s2 + $0x38] sm:$0xff]  ;;  %s4663_s2 = sld [smem:[#allocation13_spill]] (!%p3340_p5) }
 0x644   : > { %3521 = vmatprep.mubr.msk.f32.mxu1 %vm3885_vm4, %v3886_v4  ;;  %3718 = vmatpush3.bf16.msra.mxu0 %v4331_v25 }
 0x645   : > { %3725 = vmatprep.subr.bf16.mxu0 %v3884_v1  ;;  %3721 = vmatpush3.bf16.msra.mxu1 %v4357_v51 }
 0x646   : > { %3722 = vmatprep.subr.bf16.mxu1 %v3884_v1 }
 0x6a9   : > { %v1548_v18 = vpop.f32.mrb[2].mxu0 }
 0x6aa   : > { %v3486_v19 = vpop.f32.mrb[3].mxu0 }
 0x6ab   : > { %v4411_v19 = vld [vmem:[%s4660_s19] ss:$0 sm:$0xff] }
 0x70e   : > { %v1625_v26 = vpop.f32.mrb[8].mxu1 }
 0x70f   : > { %1784 = vrot.lane.b32.xlu0 %v1625_v26, %s3892_s0  ;;  %v3491_v27 = vpop.f32.mrb[9].mxu1 }
 0x712   : > { %v1702_v28 = vpop.f32.mrb[4].mxu0 }
 0x713   : > { %1788 = vrot.lane.b32.xlu1 %v1702_v28, %s3893_s18  ;;  %v3496_v29 = vpop.f32.mrb[5].mxu0 }
 0x716   : > { %v1779_v30 = vpop.f32.mrb[10].mxu1 }
 0x717   : > { %1792 = vrot.lane.b32.xlu0 %v1779_v30, %s3894_s17  ;;  %v3501_v31 = vpop.f32.mrb[11].mxu1 }
 0x781   : > { %v1785_v32 = vpop.permute.xlu0 %1784 }
 0x782   : > { %v1795_v34 = vsel %vm1125_vm6, %v1548_v18, %v1785_v32  ;;  %v4403_v18 = vpack.c.bf16 %v1004_v17, %v1003_v16 }
 0x785   : > { %v1789_v33 = vpop.permute.xlu1 %1788 }
 0x786   : > { %v1797_v35 = vsel %vm1796_vm10, %v1795_v34, %v1789_v33 }
 0x789   : > { %v1793_v36 = vpop.permute.xlu0 %1792 }
 0x78a   : > { %v1799_v37 = vsel %vm1798_vm11, %v1797_v35, %v1793_v36 }
 0x78b   : > { %3511 = vmatmul.mubr.msk.f32.vlgmr.msra.gmra.mrb[6].mxu0 %vm1042_vm5, %v1799_v37 }
 0x78c   : > { %3540 = vmatprep.mubr.msk.f32.mxu0 %vm3885_vm4, %v3886_v4  ;;  %3727 = vmatpush3.bf16.msra.mxu0 %v4385_v6 }
 0x78d   : > { %3728 = vmatprep.subr.bf16.mxu0 %v3884_v1 }
 0x790   : > { %3730 = vmatpush3.bf16.msra.mxu0 %v4391_v9 }
 0x791   : > { %3731 = vmatprep.subr.bf16.mxu0 %v3884_v1 }
 0x794   : > { %3733 = vmatpush3.bf16.msra.mxu0 %v4397_v14 }
 0x795   : > { %3734 = vmatprep.subr.bf16.mxu0 %v3884_v1 }
 0x798   : > { %3736 = vmatpush3.bf16.msra.mxu0 %v4403_v18 }
 0x85e   : > { %v1875_v39 = vpop.f32.mrb[6].mxu0 }
 0x85f   : > { %v1876_v40 = vadd.f32 %v4349_v38, %v1875_v39  ;;  %v3512_v41 = vpop.f32.mrb[7].mxu0 }
 0x861   : > { %v1879_v42 = vadd.f32 %v1876_v40, %v4198_v55  ;;  %v994_v55 = vld [vmem:[%s4049_s6 + $0x10] sm:$0xff]  ;;  %s4661_s6 = scalar_lea.vmem %s4628_s15, %s4009_s20 }
 0x862   : > { %v4363_v53 = vpack.c.bf16 %v995_v52, %v994_v55  ;;  %v4420_v30 = vld [vmem:[%s4661_s6] ss:$0 sm:$0xff] }
 0x863   : > { %v1880_v43 = vsel %vm1007_vm3, %v1879_v42, 0.0 }
 0x864   : > { %1881 = vadd.xlane.f32.xlu1 %v1880_v43  ;;  %3724 = vmatpush3.bf16.msra.mxu1 %v4363_v53 }
 0x8f1   : > { %v1882_v44 = vpop.xlane.xlu1 %1881 }
 0x8f2   : > { %v1883_v45 = vmul.f32 0.03125, %v1882_v44 }
 0x8f4   : > { %v1884_v46 = vsub.f32 %v1879_v42, %v1883_v45 }
 0x8f6   : > { %v1885_v47 = vmul.f32 %v1884_v46, %v1884_v46 }
 0x8f8   : > { %v1886_v48 = vsel %vm1007_vm3, %v1885_v47, 0.0 }
 0x8f9   : > { %1887 = vadd.xlane.f32.xlu0 %v1886_v48  ;;  %v2080_v48 = vld [vmem:[%s4664_s24] sm:$0x1] (!%p3340_p5) }
 0x986   : > { %v1888_v54 = vpop.xlane.xlu0 %1887 }
 0x987   : > { %v1889_v56 = vmul.f32 0.03125, %v1888_v54 }
 0x989   : > { %v1890_v57 = vadd.f32 1e-05, %v1889_v56 }
 0x98b   : > { %3815 = vrsqrt.f32 %v1890_v57 }
 0x995   : > { %v3816_v58 = vpop.eup %3815 }
 0x996   : > { %v1892_v60 = vmul.f32 %v3816_v58, %v1884_v46  ;;  %v2079_v46 = vld [vmem:[%s4663_s2] sm:$0x1] (!%p3340_p5) }
 0x998   : > { %v1899_v62 = vmul.f32 %v4371_v59, %v1892_v60 }
 0x99a   : > { %v1906_v63 = vadd.f32 %v4378_v61, %v1899_v62 }
 0x99c   : > { %3522 = vmatmul.mubr.msk.f32.vlgmr.msra.gmra.mrb[12].mxu1 %vm1042_vm5, %v1906_v63 }
 0xa6f   : > { %v1982_v20 = vpop.f32.mrb[12].mxu1 }
 0xa70   : > { %v1983_v21 = vadd.f32 %v4411_v19, %v1982_v20  ;;  %v3523_v23 = vpop.f32.mrb[13].mxu1 }
 0xa72   : > { %v1987_v24 = vmul.f32 0.70710677, %v1983_v21  ;;  %v1986_v27 = vmul.f32 0.5, %v1983_v21 }
 0xa74   : > { %3817 = verf.f32 %v1987_v24 }
 0xa7e   : > { %v3818_v26 = vpop.eup %3817 }
 0xa7f   : > { %v1989_v28 = vadd.f32 1.0, %v3818_v26 }
 0xa81   : > { %v1990_v29 = vmul.f32 %v1989_v28, %v1986_v27 }
 0xa83   : > { %3541 = vmatmul.mubr.msk.f32.vlgmr.msra.gmra.mrb[8].mxu0 %vm1991_vm12, %v1990_v29 }
 0xb55   : > { %2077 = sbr.rel (%p3340_p5) target bundleno = 3221 (0xc95), region = 100 }
 0xb56   : > { %v2061_v31 = vpop.f32.mrb[8].mxu0 }
 0xb57   : > { %v2065_v32 = vadd.f32 %v2061_v31, %v1879_v42  ;;  %v3542_v33 = vpop.f32.mrb[9].mxu0 }
 0xb59   : > { %v2072_v34 = vadd.f32 %v4420_v30, %v2065_v32 }
 0xb5b   : > { %2073 = vst.msk [vmem:[#allocation2] sm:$0x1f] %vm1007_vm3, %v2072_v34  ;;  %2078 = vst.msk [vmem:[%s4662_s27] sm:$0x1f] (!%p3340_p5), %vm1007_vm3, %v2072_v34  ;;  %v2082_v35 = vsel (!%p3340_p5), %vm2081_vm13, %v2072_v34, 0.0 }
 0xb5c   : > { %2083 = vadd.xlane.f32.xlu0 %v2082_v35 }
 0xbe9   : > { %v2084_v36 = vpop.xlane.xlu0 %2083 }
 0xbea   : > { %v2085_v37 = vmul.f32 0.03125, %v2084_v36 }
 0xbec   : > { %v2086_v39 = vsub.f32 %v2072_v34, %v2085_v37 }
 0xbee   : > { %v2087_v40 = vmul.f32 %v2086_v39, %v2086_v39 }
 0xbf0   : > { %v2088_v41 = vsel %vm2081_vm13, %v2087_v40, 0.0 }
 0xbf1   : > { %2089 = vadd.xlane.f32.xlu0 %v2088_v41 }
 0xc7e   : > { %v2090_v42 = vpop.xlane.xlu0 %2089 }
 0xc7f   : > { %v2091_v43 = vmul.f32 0.03125, %v2090_v42 }
 0xc81   : > { %v2092_v44 = vadd.f32 1e-05, %v2091_v43 }
 0xc83   : > { %3819 = vrsqrt.f32 %v2092_v44 }
 0xc8d   : > { %v3820_v45 = vpop.eup %3819 }
 0xc8e   : > { %v2094_v47 = vmul.f32 %v3820_v45, %v2086_v39 }
 0xc90   : > { %v2095_v49 = vmul.f32 %v2094_v47, %v2079_v46 }
 0xc92   : > { %v2096_v50 = vadd.f32 %v2095_v49, %v2080_v48 }
 0xc94   : > { %2097 = vst.msk [vmem:[#allocation3] sm:$0x1] %vm2081_vm13, %v2096_v50 }
 0xc95 PF: > { %v4440_v55 = vld [vmem:[#allocation2 + $0x8] sm:$0x1f]  ;;  %3737 = vmatprep.subr.bf16.mxu1 %v3884_v1  ;;  %3551 = vmatprep.mubr.msk.f32.mxu1 %vm3885_vm4, %v3886_v4  ;;  %vm3116_vm14 = vcmask (!%p3340_p5), 253952   ;;  %s4667_s27 = sld [smem:[#allocation14_spill]] (!%p3340_p5) }
 0xc96   : > { %v2100_v52 = vsel %vm1007_vm3, %v4440_v55, 0.0  ;;  %3739 = vmatpush3.bf16.msra.mxu1 %v4208_v2  ;;  %3564 = vmatprep.subr.mxu0 %v3886_v4 }
 0xc97   : > { %2101 = vadd.xlane.f32.xlu0 %v2100_v52  ;;  %3740 = vmatprep.subr.bf16.mxu1 %v3884_v1 }
 0xc98   : > { %3566 = vmatprep.mubr.msk.f32.mxu0 %vm3885_vm4, %v3886_v4 }
 0xc9a   : > { %3742 = vmatpush3.bf16.msra.mxu1 %v4217_v5 }
 0xc9b   : > { %3554 = vmatprep.subr.mxu1 %v3886_v4 }
 0xd24   : > { %v2102_v54 = vpop.xlane.xlu0 %2101 }
 0xd25   : > { %v2103_v56 = vmul.f32 0.03125, %v2102_v54 }
 0xd27   : > { %v2104_v57 = vsub.f32 %v4440_v55, %v2103_v56 }
 0xd29   : > { %v2105_v58 = vmul.f32 %v2104_v57, %v2104_v57 }
 0xd2b   : > { %v2106_v60 = vsel %vm1007_vm3, %v2105_v58, 0.0 }
 0xd2c   : > { %2107 = vadd.xlane.f32.xlu0 %v2106_v60 }
 0xdb9   : > { %v2108_v2 = vpop.xlane.xlu0 %2107 }
 0xdba   : > { %v2109_v62 = vmul.f32 0.03125, %v2108_v2 }
 0xdbc   : > { %v2110_v63 = vadd.f32 1e-05, %v2109_v62 }
 0xdbe   : > { %3821 = vrsqrt.f32 %v2110_v63 }
 0xdc8   : > { %v3822_v0 = vpop.eup %3821 }
 0xdc9   : > { %v2112_v3 = vmul.f32 %v3822_v0, %v2104_v57 }
 0xdcb   : > { %v2113_v7 = vmul.f32 %v4227_v10, %v2112_v3 }
 0xdcd   : > { %v2114_v5 = vadd.f32 %v4234_v12, %v2113_v7 }
 0xdcf   : > { %3552 = vmatmul.mubr.msk.f32.vlgmr.msra.gmra.mrb[14].mxu1 %vm1042_vm5, %v2114_v5 }
 0xdd0   : > { %3556 = vmatprep.mubr.msk.f32.mxu1 %vm3885_vm4, %v3886_v4 }
 0xea2   : > { %v2184_v8 = vpop.f32.mrb[14].mxu1 }
 0xea3   : > { %v2185_v11 = vadd.f32 %v4246_v15, %v2184_v8  ;;  %v3553_v13 = vpop.f32.mrb[15].mxu1 }
 0xea5   : > { %2193 = vrot.lane.b32.xlu0 %v2185_v11, %s3887_s8  ;;  %2189 = vrot.lane.b32.xlu1 %v2185_v11, %s3888_s21 }
 0xea9   : > { %2191 = vrot.lane.b32.xlu1 %v2185_v11, %s3889_s3  ;;  %s4665_s3 = sld [smem:[#allocation15_spill]] (!%p3340_p5) }
 0xead   : > { %2195 = vrot.lane.b32.xlu1 %v2185_v11, %s3890_s23 }
 0xf17   : > { %v4466_v10 = vpop.permute.xlu1 %2189  ;;  %v4474_v15 = vpop.permute.xlu0 %2193 }
 0xf18   : > { %2271 = vrot.lane.b32.xlu1 %v4466_v10, %s3890_s23 }
 0xf1b   : > { %v4470_v12 = vpop.permute.xlu1 %2191 }
 0xf1c   : > { %2347 = vrot.lane.b32.xlu1 %v4470_v12, %s3890_s23 }
 0xf1f   : > { %v2196_v16 = vpop.permute.xlu1 %2195 }
 0xf20   : > { %2423 = vrot.lane.b32.xlu1 %v4474_v15, %s3890_s23  ;;  %3555 = vmatpush3.xpose.msk.msra.mxu1 %vm1125_vm6, %v2196_v16 }
 0xf21   : > { %3559 = vmatprep.subr.mxu1 %v3886_v4 }
 0xf23   : > { %3557 = vmatmul.mubr.msk.f32.vlgmr.msra.gmra.mrb[16].mxu1 %vm1125_vm6, %v2185_v11 }
 0xf24   : > { %3561 = vmatprep.mubr.msk.f32.mxu1 %vm3885_vm4, %v3886_v4 }
 0xf8a   : > { %v2272_v17 = vpop.permute.xlu1 %2271 }
 0xf8b   : > { %3560 = vmatpush3.xpose.msk.msra.mxu1 %vm1125_vm6, %v2272_v17 }
 0xf8c   : > { %3569 = vmatprep.subr.mxu1 %v3886_v4 }
 0xf8e   : > { %3562 = vmatmul.mubr.msk.f32.vlgmr.msra.gmra.mrb[18].mxu1 %vm1125_vm6, %v4466_v10  ;;  %v2348_v20 = vpop.permute.xlu1 %2347 }
 0xf8f   : > { %3565 = vmatpush3.xpose.msk.msra.mxu0 %vm1125_vm6, %v2348_v20  ;;  %3571 = vmatprep.mubr.msk.f32.mxu1 %vm3885_vm4, %v3886_v4 }
 0xf90   : > { %3574 = vmatprep.subr.mxu0 %v3886_v4 }
 0xf92   : > { %3567 = vmatmul.mubr.msk.f32.vlgmr.msra.gmra.mrb[10].mxu0 %vm1125_vm6, %v4470_v12  ;;  %v2424_v21 = vpop.permute.xlu1 %2423 }
 0xf93   : > { %3570 = vmatpush3.xpose.msk.msra.mxu1 %vm1125_vm6, %v2424_v21  ;;  %3576 = vmatprep.mubr.msk.f32.mxu0 %vm3885_vm4, %v3886_v4 }
 0xf94   : > { %3579 = vmatprep.subr.mxu1 %v3886_v4 }
 0xf96   : > { %3572 = vmatmul.mubr.msk.f32.vlgmr.msra.gmra.mrb[20].mxu1 %vm1125_vm6, %v4474_v15 }
 0xf97   : > { %3581 = vmatprep.mubr.msk.f32.mxu1 %vm3885_vm4, %v3886_v4 }
 0xff6   : > { %v2267_v23 = vpop.f32.mrb[16].mxu1 }
 0xff7   : > { %v3558_v24 = vpop.f32.mrb[17].mxu1  ;;  %v2499_v26 = vsel %vm1428_vm7, %v2267_v23, -inf }
 0xff8   : > { %2500 = vmax.xlane.f32.xlu1 %v2499_v26 }
0x1061   : > { %v2343_v27 = vpop.f32.mrb[18].mxu1 }
0x1062   : > { %v3563_v28 = vpop.f32.mrb[19].mxu1  ;;  %v2502_v29 = vsel %vm1428_vm7, %v2343_v27, -inf }
0x1063   : > { %2503 = vmax.xlane.f32.xlu0 %v2502_v29 }
0x1065   : > { %v2419_v31 = vpop.f32.mrb[10].mxu0 }
0x1066   : > { %v3568_v32 = vpop.f32.mrb[11].mxu0  ;;  %v2505_v33 = vsel %vm1428_vm7, %v2419_v31, -inf }
0x1067   : > { %2506 = vmax.xlane.f32.xlu1 %v2505_v33 }
0x1069   : > { %v2495_v34 = vpop.f32.mrb[20].mxu1 }
0x106a   : > { %v3573_v35 = vpop.f32.mrb[21].mxu1  ;;  %v2508_v36 = vsel %vm1428_vm7, %v2495_v34, -inf }
0x106b   : > { %2509 = vmax.xlane.f32.xlu0 %v2508_v36 }
0x1078   : > { %2543 = vrot.lane.b32.xlu1 %v2185_v11, %s3891_s26 }
0x1085   : > { %v2501_v37 = vpop.xlane.xlu1 %2500 }
0x1086   : > { %v2511_v39 = vsub.f32 %v2267_v23, %v2501_v37 }
0x1088   : > { %v2515_v40 = vmul.f32 1.442695, %v2511_v39 }
0x108a   : > { %3823 = vpow2.f32 %v2515_v40 }
0x1094   : > { %v3824_v41 = vpop.eup %3823 }
0x1095   : > { %v2523_v42 = vsel %vm1428_vm7, %v3824_v41, 0.0 }
0x109c   : > { %2524 = vadd.xlane.f32.xlu1 %v2523_v42 }
0x10f0   : > { %v2504_v43 = vpop.xlane.xlu0 %2503 }
0x10f1   : > { %v2512_v44 = vsub.f32 %v2343_v27, %v2504_v43 }
0x10f3   : > { %v2517_v45 = vmul.f32 1.442695, %v2512_v44 }
0x10f4   : > { %v2507_v46 = vpop.xlane.xlu1 %2506 }
0x10f5   : > { %3825 = vpow2.f32 %v2517_v45  ;;  %v2513_v47 = vsub.f32 %v2419_v31, %v2507_v46 }
0x10f7   : > { %v2519_v48 = vmul.f32 1.442695, %v2513_v47 }
0x10f8   : > { %v2544_v49 = vpop.permute.xlu1 %2543  ;;  %v2510_v50 = vpop.xlane.xlu0 %2509 }
0x10f9   : > { %3827 = vpow2.f32 %v2519_v48  ;;  %v2514_v52 = vsub.f32 %v2495_v34, %v2510_v50  ;;  %3575 = vmatpush3.msk.msra.mxu0 %vm1479_vm8, %v2544_v49 }
0x10fa   : > { %3584 = vmatprep.subr.mxu0 %v3886_v4 }
0x10fb   : > { %v2521_v54 = vmul.f32 1.442695, %v2514_v52 }
0x10fd   : > { %3829 = vpow2.f32 %v2521_v54 }
0x10ff   : > { %v3826_v56 = vpop.eup %3825 }
0x1100   : > { %v2526_v57 = vsel %vm1428_vm7, %v3826_v56, 0.0 }
0x1101   : > { %2527 = vadd.xlane.f32.xlu0 %v2526_v57 }
0x1103   : > { %v3828_v58 = vpop.eup %3827 }
0x1104   : > { %v2529_v60 = vsel %vm1428_vm7, %v3828_v58, 0.0 }
0x1105   : > { %2530 = vadd.xlane.f32.xlu1 %v2529_v60 }
0x1107   : > { %v3830_v2 = vpop.eup %3829 }
0x1108   : > { %v2532_v62 = vsel %vm1428_vm7, %v3830_v2, 0.0 }
0x1109   : > { %2533 = vadd.xlane.f32.xlu0 %v2532_v62 }
0x1116   : > { %2697 = vrot.lane.b32.xlu1 %v4470_v12, %s3891_s26 }
0x111a   : > { %2774 = vrot.lane.b32.xlu1 %v4474_v15, %s3891_s26 }
0x111f   : > { %2620 = vrot.lane.b32.xlu0 %v4466_v10, %s3891_s26 }
0x1129   : > { %v2525_v63 = vpop.xlane.xlu1 %2524 }
0x112a   : > { %3831 = vrcp.f32 %v2525_v63 }
0x1134   : > { %v3832_v0 = vpop.eup %3831 }
0x1135   : > { %v2539_v3 = vmul.f32 %v3832_v0, %v3824_v41 }
0x1137   : > { %3577 = vmatmul.mubr.msk.f32.vlgmr.msra.gmra.mrb[12].mxu0 %vm1475_vm9, %v2539_v3 }
0x1138   : > { %3586 = vmatprep.mubr.msk.f32.mxu0 %vm3885_vm4, %v3886_v4 }
0x118e   : > { %v2528_v7 = vpop.xlane.xlu0 %2527 }
0x118f   : > { %3833 = vrcp.f32 %v2528_v7 }
0x1192   : > { %v2531_v5 = vpop.xlane.xlu1 %2530 }
0x1193   : > { %3835 = vrcp.f32 %v2531_v5 }
0x1196   : > { %v2698_v8 = vpop.permute.xlu1 %2697  ;;  %v2534_v11 = vpop.xlane.xlu0 %2533 }
0x1197   : > { %3837 = vrcp.f32 %v2534_v11  ;;  %3585 = vmatpush3.msk.msra.mxu0 %vm1479_vm8, %v2698_v8  ;;  %v3115_v11 = vld [vmem:[%s4667_s27] sm:$0x1] (!%p3340_p5) }
0x1198   : > { %3743 = vmatprep.subr.bf16.mxu0 %v3884_v1 }
0x1199   : > { %v3834_v13 = vpop.eup %3833 }
0x119a   : > { %v2621_v10 = vpop.permute.xlu0 %2620  ;;  %v2540_v12 = vmul.f32 %v3834_v13, %v3826_v56  ;;  %v2775_v15 = vpop.permute.xlu1 %2774 }
0x119b   : > { %3580 = vmatpush3.msk.msra.mxu1 %vm1479_vm8, %v2621_v10 }
0x119c   : > { %3582 = vmatmul.mubr.msk.f32.vlgmr.msra.gmra.mrb[22].mxu1 %vm1475_vm9, %v2540_v12  ;;  %3589 = vmatprep.subr.mxu1 %v3886_v4 }
0x119d   : > { %v3836_v16 = vpop.eup %3835  ;;  %3590 = vmatpush3.msk.msra.mxu1 %vm1479_vm8, %v2775_v15  ;;  %3591 = vmatprep.mubr.msk.f32.mxu1 %vm3885_vm4, %v3886_v4 }
0x119e   : > { %v2541_v17 = vmul.f32 %v3836_v16, %v3828_v58  ;;  %3749 = vmatprep.subr.bf16.mxu1 %v3884_v1 }
0x11a0   : > { %3587 = vmatmul.mubr.msk.f32.vlgmr.msra.gmra.mrb[14].mxu0 %vm1475_vm9, %v2541_v17 }
0x11a1   : > { %v3838_v20 = vpop.eup %3837  ;;  %3745 = vmatpush3.bf16.msra.mxu0 %v4325_v22  ;;  %3602 = vmatprep.mubr.msk.f32.mxu0 %vm3885_vm4, %v3886_v4 }
0x11a2   : > { %v2542_v21 = vmul.f32 %v3838_v20, %v3830_v2  ;;  %3746 = vmatprep.subr.bf16.mxu0 %v3884_v1 }
0x11a4   : > { %3592 = vmatmul.mubr.msk.f32.vlgmr.msra.gmra.mrb[24].mxu1 %vm1475_vm9, %v2542_v21 }
0x11a5   : > { %3748 = vmatpush3.bf16.msra.mxu0 %v4331_v25  ;;  %3751 = vmatpush3.bf16.msra.mxu1 %v4357_v51 }
0x11a6   : > { %3752 = vmatprep.subr.bf16.mxu1 %v3884_v1  ;;  %3613 = vmatprep.mubr.msk.f32.mxu1 %vm3885_vm4, %v3886_v4 }
0x11a7   : > { %3755 = vmatprep.subr.bf16.mxu0 %v3884_v1 }
0x11a9   : > { %3754 = vmatpush3.bf16.msra.mxu1 %v4363_v53 }
0x120a   : > { %v2616_v22 = vpop.f32.mrb[12].mxu0 }
0x120b   : > { %v3578_v23 = vpop.f32.mrb[13].mxu0 }
0x126f   : > { %v2693_v24 = vpop.f32.mrb[22].mxu1 }
0x1270   : > { %2852 = vrot.lane.b32.xlu0 %v2693_v24, %s3892_s0  ;;  %v3583_v26 = vpop.f32.mrb[23].mxu1  ;;  %s4666_s0 = sld [smem:[#allocation13_spill]] (!%p3340_p5) }
0x1273   : > { %v2770_v27 = vpop.f32.mrb[14].mxu0 }
0x1274   : > { %2856 = vrot.lane.b32.xlu1 %v2770_v27, %s3893_s18  ;;  %v3588_v25 = vpop.f32.mrb[15].mxu0 }
0x1276   : > { %v3114_v5 = vld [vmem:[%s4666_s0] sm:$0x1] (!%p3340_p5) }
0x1277   : > { %v2847_v51 = vpop.f32.mrb[24].mxu1 }
0x1278   : > { %2860 = vrot.lane.b32.xlu0 %v2847_v51, %s3894_s17  ;;  %v3593_v28 = vpop.f32.mrb[25].mxu1 }
0x12e2   : > { %v2853_v29 = vpop.permute.xlu0 %2852 }
0x12e3   : > { %v2863_v32 = vsel %vm1125_vm6, %v2616_v22, %v2853_v29 }
0x12e6   : > { %v2857_v31 = vpop.permute.xlu1 %2856 }
0x12e7   : > { %v2864_v53 = vsel %vm1796_vm10, %v2863_v32, %v2857_v31 }
0x12ea   : > { %v2861_v33 = vpop.permute.xlu0 %2860 }
0x12eb   : > { %v2865_v34 = vsel %vm1798_vm11, %v2864_v53, %v2861_v33 }
0x12ec   : > { %3603 = vmatmul.mubr.msk.f32.vlgmr.msra.gmra.mrb[16].mxu0 %vm1042_vm5, %v2865_v34 }
0x12ed   : > { %3757 = vmatpush3.bf16.msra.mxu0 %v4385_v6  ;;  %3632 = vmatprep.mubr.msk.f32.mxu0 %vm3885_vm4, %v3886_v4 }
0x12ee   : > { %3758 = vmatprep.subr.bf16.mxu0 %v3884_v1 }
0x12f1   : > { %3760 = vmatpush3.bf16.msra.mxu0 %v4391_v9 }
0x12f2   : > { %3761 = vmatprep.subr.bf16.mxu0 %v3884_v1 }
0x12f5   : > { %3763 = vmatpush3.bf16.msra.mxu0 %v4397_v14 }
0x12f6   : > { %3764 = vmatprep.subr.bf16.mxu0 %v3884_v1 }
0x12f9   : > { %3766 = vmatpush3.bf16.msra.mxu0 %v4403_v18 }
0x13bf   : > { %v2935_v35 = vpop.f32.mrb[16].mxu0 }
0x13c0   : > { %v2936_v36 = vadd.f32 %v4349_v38, %v2935_v35  ;;  %v3604_v37 = vpop.f32.mrb[17].mxu0 }
0x13c2   : > { %v2939_v6 = vadd.f32 %v2936_v36, %v4440_v55 }
0x13c4   : > { %v2940_v4 = vsel %vm1007_vm3, %v2939_v6, 0.0 }
0x13c5   : > { %2941 = vadd.xlane.f32.xlu1 %v2940_v4 }
0x1452   : > { %v2942_v39 = vpop.xlane.xlu1 %2941 }
0x1453   : > { %v2943_v40 = vmul.f32 0.03125, %v2942_v39 }
0x1455   : > { %v2944_v9 = vsub.f32 %v2939_v6, %v2943_v40 }
0x1457   : > { %v2945_v41 = vmul.f32 %v2944_v9, %v2944_v9 }
0x1459   : > { %v2946_v42 = vsel %vm1007_vm3, %v2945_v41, 0.0 }
0x145a   : > { %2947 = vadd.xlane.f32.xlu0 %v2946_v42 }
0x14e7   : > { %v2948_v14 = vpop.xlane.xlu0 %2947 }
0x14e8   : > { %v2949_v1 = vmul.f32 0.03125, %v2948_v14 }
0x14ea   : > { %v2950_v43 = vadd.f32 1e-05, %v2949_v1 }
0x14ec   : > { %3839 = vrsqrt.f32 %v2950_v43 }
0x14f6   : > { %v3840_v18 = vpop.eup %3839 }
0x14f7   : > { %v2952_v44 = vmul.f32 %v3840_v18, %v2944_v9 }
0x14f9   : > { %v2953_v38 = vmul.f32 %v4371_v59, %v2952_v44 }
0x14fb   : > { %v2954_v55 = vadd.f32 %v4378_v61, %v2953_v38 }
0x14fd   : > { %3614 = vmatmul.mubr.msk.f32.vlgmr.msra.gmra.mrb[26].mxu1 %vm1042_vm5, %v2954_v55 }
0x15d0   : > { %v3024_v45 = vpop.f32.mrb[26].mxu1 }
0x15d1   : > { %v3025_v46 = vadd.f32 %v4411_v19, %v3024_v45  ;;  %v3615_v47 = vpop.f32.mrb[27].mxu1 }
0x15d3   : > { %v3029_v48 = vmul.f32 0.70710677, %v3025_v46  ;;  %v3028_v50 = vmul.f32 0.5, %v3025_v46 }
0x15d5   : > { %3841 = verf.f32 %v3029_v48 }
0x15df   : > { %v3842_v49 = vpop.eup %3841 }
0x15e0   : > { %v3031_v52 = vadd.f32 1.0, %v3842_v49 }
0x15e2   : > { %v3032_v54 = vmul.f32 %v3031_v52, %v3028_v50 }
0x15e4   : > { %3633 = vmatmul.mubr.msk.f32.vlgmr.msra.gmra.mrb[18].mxu0 %vm1991_vm12, %v3032_v54 }
0x16b6   : > { %3111 = sbr.rel (%p3340_p5) target bundleno = 6134 (0x17f6), region = 104 }
0x16b7   : > { %v3102_v56 = vpop.f32.mrb[18].mxu0 }
0x16b8   : > { %v3106_v57 = vadd.f32 %v3102_v56, %v2939_v6  ;;  %v3634_v58 = vpop.f32.mrb[19].mxu0 }
0x16ba   : > { %v3107_v59 = vadd.f32 %v4420_v30, %v3106_v57 }
0x16bc   : > { %3108 = vst.msk [vmem:[#allocation2 + $0x8] sm:$0x1f] %vm1007_vm3, %v3107_v59  ;;  %3362 = vst.msk [vmem:[%s4665_s3 + $0x8] sm:$0x1f] (!%p3340_p5), %vm1007_vm3, %v3107_v59  ;;  %v3117_v61 = vsel (!%p3340_p5), %vm3116_vm14, %v3107_v59, 0.0 }
0x16bd   : > { %3118 = vadd.xlane.f32.xlu0 %v3117_v61 }
0x174a   : > { %v3119_v19 = vpop.xlane.xlu0 %3118 }
0x174b   : > { %v3120_v60 = vmul.f32 0.03125, %v3119_v19 }
0x174d   : > { %v3121_v2 = vsub.f32 %v3107_v59, %v3120_v60 }
0x174f   : > { %v3122_v62 = vmul.f32 %v3121_v2, %v3121_v2 }
0x1751   : > { %v3123_v30 = vsel %vm3116_vm14, %v3122_v62, 0.0 }
0x1752   : > { %3124 = vadd.xlane.f32.xlu0 %v3123_v30 }
0x17df   : > { %v3125_v63 = vpop.xlane.xlu0 %3124 }
0x17e0   : > { %v3126_v0 = vmul.f32 0.03125, %v3125_v63 }
0x17e2   : > { %v3127_v3 = vadd.f32 1e-05, %v3126_v0 }
0x17e4   : > { %3843 = vrsqrt.f32 %v3127_v3 }
0x17ee   : > { %v3844_v7 = vpop.eup %3843 }
0x17ef   : > { %v3129_v8 = vmul.f32 %v3844_v7, %v3121_v2 }
0x17f1   : > { %v3130_v13 = vmul.f32 %v3129_v8, %v3114_v5 }
0x17f3   : > { %v3131_v10 = vadd.f32 %v3130_v13, %v3115_v11 }
0x17f5   : > { %3133 = vst.msk [vmem:[#allocation3 + $0x1] sm:$0x1] %vm3116_vm14, %v3131_v10 }
0x17f6 PF: > { %p3771_p6 = scmp.eq.s32.totalorder %s4003_s30, 1  ;;  %s3895_s20 = smov [#allocation3]  }
0x17f7   : > { %s3143_s19 = sshll.u32 %s3895_s20, 4  ;;  %s3144_s19 = int_to_ptr.vmem [resolvable:$true] %s3143_s19 }
0x17f8   : > { %s3845_s2 = scalar_lea.vmem %s3144_s19, 32  ;;  %p3852_p10 = scmp.lt.s32.totalorder %s3144_s19, %s3144_s19 }
0x17f9   : > { %p3846_p7 = scmp.ne.s32.totalorder %s3144_s19, %s3845_s2  ;;  %p3853_p11 = scmp.lt.s32.totalorder %s3845_s2, %s3845_s2 }
0x17fb   : > { %p3847_p8 = pnand %p3846_p7, %p3771_p6  ;;  %p3854_p12 = por %p3853_p11, %p3852_p10 }
0x17fd   : > { %p3848_p9 = pneg %p3847_p8 }
0x17ff   : > { %p3855_p13 = pnand %p3854_p12, %p3848_p9 }
0x1801   : > { %3858 = shalt.err (!%p3855_p13)
}
0x1802   : > { %s4668_s24 = sld [smem:[#allocation16_spill]] }
0x1808   : > { %s3859_s8 = scalar_lea.hbm %s4668_s24, 32 }
0x1809   : > { %p3860_p0 = scmp.ne.s32.totalorder %s4668_s24, %s3859_s8  ;;  %p3865_p3 = scmp.lt.u32.totalorder %s3859_s8, %s4668_s24 }
0x180b   : > { %p3861_p1 = pnand %p3860_p0, %p3771_p6 }
0x180d   : > { %p3862_p2 = pneg %p3861_p1 }
0x180f   : > { %p3867_p4 = pnand %p3865_p3, %p3862_p2 }
0x1811   : > { %3870 = shalt.err (!%p3867_p4)
}
0x1812   : > { %s3896_s0 = smov 1  }
0x1813   : > { %3768 = dma.vmem_to_hbm [thread:$0]  (%p3771_p6), %s3144_s19, 32, %s4668_s24, [#allocation4], %s3893_s18, %s3893_s18, %s3896_s0  }
0x1814   : > { %3876 = dma.done.wait (%p3771_p6), [#allocation4], 32  }
0x1815   : > { %3878 = vsyncadd (%p3771_p6), [#allocation4], 4294967264 }
0x1816 PF: > { %s4669_s27 = sld [smem:[#allocation6_spill]] }
0x181c   : > { %s31_s0 = sadd.s32 1, %s4669_s27  }
0x181d   : > { %p28_p5 = scmp.ge.s32.totalorder %s31_s0, 4  }
0x181f   :  { %30 = sbr.rel (!%p28_p5) target bundleno = 12 (0xc), region = 177 }
0x1826   :  { %3162 = vsyncpa [#allocation4], 1 }
0x1827   :  { %3164 = vsyncpa [#allocation4 + $0x1], 1 }

</bundles_post_ra>
